<compile_context>
chip_gen: v7x
topology: tpu7x:2x2x1
jax: 0.10.0
libtpu: 0.0.40
codegen_flags: <defaults>
</compile_context>

<pallas_src>
import jax
import jax.numpy as jnp
from jax.experimental import pallas as pl
from jax.experimental.pallas import tpu as pltpu

# ---- small, module-consistent shapes ---------------------------------------
B = 2             # batch
L = 8             # sequence length
V = 50            # vocab size
E = 32            # embedding dim
D = 4             # amount_of_divisions
TPD = L // D      # tokens per division (2)
CHUNK = TPD * E   # 64  (= L*E / D)
R = 8             # shared TT-core rank
C = 4             # output classes of the TT head

N2 = D * B        # rows of the division-major activation slab (8)
LANES = 128       # lane-dense width used everywhere
RR = R * R        # 64
PARAM_ROWS = 3 * LANES + 8   # M + REX + FRED + (s0_rep, bias, pad)

assert TPD * V <= LANES, "one-hot width must fit in 128 lanes"
assert 2 * RR == LANES, "core + folded-head columns must fit in 128 lanes"


def tensor_text_kernel(ids_ref, params_ref, out_ref):
    """Whole forward in one VMEM-resident invocation (no grid).

    ids_ref   : (D*B, TPD)        int32  token ids, division-major (row = k*B + b)
    params_ref: (392, 128)        f32    packed parameter slab:
                rows   0..127  M    : M[t*V+v, r*R+j]      = sum_e table[v,e]*G[r,t*E+e,j]
                                       M[t*V+v, RR+r*R+c]  = sum_j (above) * w_out[j,c]
                rows 128..255  REX  : 0/1 reduce-over-r + lane-replicate matrix
                rows 256..383  FRED : 0/1 reduce-over-r matrix for the folded head
                row  384       s0 lane-replicated;  row 385  b_out (lanes 0..C-1)
    out_ref   : (B, 128)          f32    lane-padded logits (first C lanes valid)
    """
    ids = ids_ref[...]                                               # (N2, TPD) int32

    # One-hot over the padded (token-slot x vocab) axis: TPD*V = 100 -> 128 lanes.
    # NOTE: out-of-range ids give an all-zero one-hot (zero embedding); nn.Embedding
    # would raise instead.  dropout: identity (eval-mode nn.Dropout).
    col = jax.lax.broadcasted_iota(jnp.int32, (N2, LANES), 1)        # (N2, 128)
    onehot = jnp.zeros((N2, LANES), jnp.float32)
    for t in range(TPD):                                             # TPD = 2
        onehot = onehot + (col == (ids[:, t:t + 1] + t * V)).astype(jnp.float32)

    # Fused embedding gather + view(B, D, -1) + shared-core contraction (+ the
    # w_out-folded copy for the last division) in ONE MXU matmul:
    #   a_all[k*B+b, r*R+j]        = sum_i resized[b,k,i] * G[r,i,j]
    #   a_all[k*B+b, RR + r*R + c] = sum_j (above) * w_out[j,c]
    a_all = jnp.dot(onehot, params_ref[0:LANES, :],
                    preferred_element_type=jnp.float32,
                    precision=jax.lax.Precision.HIGHEST)             # (N2, 128)

    # Rank recurrence.  s is kept lane-replicated: s_rep[b, l] = s[b, (l % RR) // R],
    # so each step is: elementwise multiply (VPU) + tiny 0/1 matmul (MXU) that sums
    # over r and re-replicates the new state across all 128 lanes.
    s_rep = params_ref[3 * LANES:3 * LANES + 1, :]                   # (1, 128) s0 replicated
    for k in range(D - 1):
        p = s_rep * a_all[k * B:(k + 1) * B, :]                      # (B, 128)
        s_rep = jnp.dot(p, params_ref[LANES:2 * LANES, :],           # @ REX
                        preferred_element_type=jnp.float32,
                        precision=jax.lax.Precision.HIGHEST)         # (B, 128)

    # Last division: w_out is folded into lanes RR..127 of a_all; FRED reduces over r
    # and drops the logits into lanes 0..C-1.  Bias row finishes the head.
    p_last = s_rep * a_all[(D - 1) * B:D * B, :]                     # (B, 128)
    logits = jnp.dot(p_last, params_ref[2 * LANES:3 * LANES, :],     # @ FRED
                     preferred_element_type=jnp.float32,
                     precision=jax.lax.Precision.HIGHEST)            # (B, 128)
    out_ref[...] = logits + params_ref[3 * LANES + 1:3 * LANES + 2, :]


def prepare_params(table, g_core, s0, w_out, b_out):
    """One-time parameter repacking (hoisted out of the per-call forward path)."""
    # core[i, r, j] = G[r, i, j]
    core = jnp.transpose(g_core, (1, 0, 2))                          # (CHUNK, R, R)

    # Fused matrix M = (block-diag embedding table) @ (shared core), padded to 128x128.
    M = jnp.zeros((LANES, LANES), jnp.float32)
    for t in range(TPD):
        blk = jnp.einsum('ve,erj->vrj', table, core[t * E:(t + 1) * E])   # (V, R, R)
        blkw = jnp.einsum('vrj,jc->vrc', blk, w_out)                      # (V, R, C)
        blkw_p = jnp.zeros((V, R, R), jnp.float32).at[:, :, :C].set(blkw)
        M = M.at[t * V:(t + 1) * V, 0:RR].set(blk.reshape(V, RR))
        M = M.at[t * V:(t + 1) * V, RR:2 * RR].set(blkw_p.reshape(V, RR))

    row = jnp.arange(LANES)[:, None]
    colc = jnp.arange(LANES)[None, :]
    # REX: rows r*R+j -> all lanes l' with (l' % RR)//R == j  (sum over r + replicate)
    REX = ((row < RR) & ((colc % RR) // R == (row % R))).astype(jnp.float32)
    # FRED: rows RR + r*R + c -> lane c  (sum over r of the w_out-folded part)
    FRED = ((row >= RR) & (colc == (row - RR) % R) & (colc < C)).astype(jnp.float32)

    s0_rep = s0[0, (jnp.arange(LANES) % RR) // R]                    # (128,)
    bias = jnp.zeros((LANES,), jnp.float32).at[:C].set(b_out[0])     # (128,)

    params = jnp.concatenate(
        [M, REX, FRED, s0_rep[None, :], bias[None, :],
         jnp.zeros((PARAM_ROWS - 3 * LANES - 2, LANES), jnp.float32)],
        axis=0)                                                      # (392, 128)
    return params


def tensor_text_forward(ids, params):
    """Per-call wrapper: only token-id layout plumbing + one pallas_call."""
    # Division-major token ids: ids_dm[k*B + b, t] = ids[b, k*TPD + t]
    ids_dm = ids.reshape(B, D, TPD).transpose(1, 0, 2).reshape(N2, TPD).astype(jnp.int32)

    vmem = pl.BlockSpec(memory_space=pltpu.MemorySpace.VMEM)
    out_padded = pl.pallas_call(
        tensor_text_kernel,
        in_specs=[vmem, vmem],
        out_specs=vmem,
        out_shape=jax.ShapeDtypeStruct((B, LANES), jnp.float32),
    )(ids_dm, params)
    return out_padded[:, :C]


def _reference(ids, table, g_core, s0, w_out, b_out):
    """Pure-JAX reference with the same assumed TT semantics."""
    emb = table[ids]                                    # (B, L, E)
    resized = emb.reshape(B, D, CHUNK)                  # (B, D, CHUNK)
    s = jnp.broadcast_to(s0, (B, R))
    for k in range(D):
        a = jnp.einsum('bi,rij->brj', resized[:, k, :], g_core)   # (B, R, R)
        s = jnp.einsum('br,brj->bj', s, a)                         # (B, R)
    return s @ w_out + b_out                            # (B, C)


if __name__ == "__main__":
    key = jax.random.PRNGKey(0)
    k_ids, k_tab, k_core, k_s0, k_w, k_b = jax.random.split(key, 6)

    # deterministic synthetic parameters (shapes from the module __init__)
    text_ids = jax.random.randint(k_ids, (B, L), 0, V, dtype=jnp.int32)
    emb_table = (jax.random.normal(k_tab, (V, E), jnp.float32)
                 * (1.0 / jnp.sqrt(E)))
    g_core = (jax.random.normal(k_core, (R, CHUNK, R), jnp.float32)
              * (1.0 / jnp.sqrt(CHUNK * R)))
    s0 = jax.random.normal(k_s0, (1, R), jnp.float32) * (1.0 / jnp.sqrt(R))
    w_out = jax.random.normal(k_w, (R, C), jnp.float32) * (1.0 / jnp.sqrt(R))
    b_out = jax.random.normal(k_b, (1, C), jnp.float32) * 0.01

    # One-time parameter packing (not in the per-call path).
    params = jax.block_until_ready(prepare_params(emb_table, g_core, s0, w_out, b_out))

    fwd = jax.jit(tensor_text_forward)
    out = fwd(text_ids, params)
    out = jax.block_until_ready(out)
    assert out.shape == (B, C) and out.dtype == jnp.float32

    ref = _reference(text_ids, emb_table, g_core, s0, w_out, b_out)
    assert bool(jnp.allclose(out, ref, rtol=1e-2, atol=1e-4)), "mismatch vs reference"

    print("KERNEL_OK")
</pallas_src>

<mosaic_0001>
module attributes {stable_mosaic.version = 11 : i64} {
  func.func @tensor_text_kernel(%arg0: memref<8x2xi32, #tpu.memory_space<vmem>>, %arg1: memref<392x128xf32, #tpu.memory_space<vmem>>, %arg2: memref<2x128xf32, #tpu.memory_space<vmem>>) attributes {dimension_semantics = [], scalar_prefetch = 0 : i64, scratch_operands = 0 : i64, tpu.core_type = #tpu.core_type<tc>} {
    %c0 = arith.constant 0 : index
    %c0_0 = arith.constant 0 : index
    %0 = vector.load %arg0[%c0, %c0_0] : memref<8x2xi32, #tpu.memory_space<vmem>>, vector<8x2xi32>
    %1 = tpu.iota {dimensions = array<i32: 1>} : vector<8x128xi32>
    %cst = arith.constant 0.000000e+00 : f32
    %2 = vector.broadcast %cst : f32 to vector<8x128xf32>
    %3 = vector.extract_strided_slice %0 {offsets = [0, 0], sizes = [8, 1], strides = [1, 1]} : vector<8x2xi32> to vector<8x1xi32>
    %c0_i32 = arith.constant 0 : i32
    %4 = vector.broadcast %c0_i32 : i32 to vector<8x1xi32>
    %5 = arith.addi %3, %4 : vector<8x1xi32>
    %6 = vector.broadcast %5 : vector<8x1xi32> to vector<8x128xi32>
    %7 = arith.cmpi eq, %1, %6 : vector<8x128xi32>
    %8 = arith.extui %7 : vector<8x128xi1> to vector<8x128xi32>
    %9 = arith.sitofp %8 : vector<8x128xi32> to vector<8x128xf32>
    %10 = arith.addf %2, %9 : vector<8x128xf32>
    %11 = vector.extract_strided_slice %0 {offsets = [0, 1], sizes = [8, 1], strides = [1, 1]} : vector<8x2xi32> to vector<8x1xi32>
    %c50_i32 = arith.constant 50 : i32
    %12 = vector.broadcast %c50_i32 : i32 to vector<8x1xi32>
    %13 = arith.addi %11, %12 : vector<8x1xi32>
    %14 = vector.broadcast %13 : vector<8x1xi32> to vector<8x128xi32>
    %15 = arith.cmpi eq, %1, %14 : vector<8x128xi32>
    %16 = arith.extui %15 : vector<8x128xi1> to vector<8x128xi32>
    %17 = arith.sitofp %16 : vector<8x128xi32> to vector<8x128xf32>
    %18 = arith.addf %10, %17 : vector<8x128xf32>
    %c0_1 = arith.constant 0 : index
    %c0_2 = arith.constant 0 : index
    %19 = vector.load %arg1[%c0_1, %c0_2] : memref<392x128xf32, #tpu.memory_space<vmem>>, vector<128x128xf32>
    %cst_3 = arith.constant dense<0.000000e+00> : vector<8x128xf32>
    %20 = tpu.matmul %18, %19, %cst_3 {dimension_numbers = #tpu.dot_dimension_numbers<[1], [0], [0], [1], [0, 0, 1, 1], [], []>, precision = #tpu.contract_precision<fp32>} : vector<8x128xf32>, vector<128x128xf32>, vector<8x128xf32> -> vector<8x128xf32>
    %c384 = arith.constant 384 : index
    %c0_4 = arith.constant 0 : index
    %21 = vector.load %arg1[%c384, %c0_4] : memref<392x128xf32, #tpu.memory_space<vmem>>, vector<1x128xf32>
    %22 = vector.extract_strided_slice %20 {offsets = [0, 0], sizes = [2, 128], strides = [1, 1]} : vector<8x128xf32> to vector<2x128xf32>
    %23 = vector.broadcast %21 : vector<1x128xf32> to vector<2x128xf32>
    %24 = arith.mulf %23, %22 : vector<2x128xf32>
    %c128 = arith.constant 128 : index
    %c0_5 = arith.constant 0 : index
    %25 = vector.load %arg1[%c128, %c0_5] : memref<392x128xf32, #tpu.memory_space<vmem>>, vector<128x128xf32>
    %cst_6 = arith.constant dense<0.000000e+00> : vector<2x128xf32>
    %26 = tpu.matmul %24, %25, %cst_6 {dimension_numbers = #tpu.dot_dimension_numbers<[1], [0], [0], [1], [0, 0, 1, 1], [], []>, precision = #tpu.contract_precision<fp32>} : vector<2x128xf32>, vector<128x128xf32>, vector<2x128xf32> -> vector<2x128xf32>
    %27 = vector.extract_strided_slice %20 {offsets = [2, 0], sizes = [2, 128], strides = [1, 1]} : vector<8x128xf32> to vector<2x128xf32>
    %28 = arith.mulf %26, %27 : vector<2x128xf32>
    %c128_7 = arith.constant 128 : index
    %c0_8 = arith.constant 0 : index
    %29 = vector.load %arg1[%c128_7, %c0_8] : memref<392x128xf32, #tpu.memory_space<vmem>>, vector<128x128xf32>
    %cst_9 = arith.constant dense<0.000000e+00> : vector<2x128xf32>
    %30 = tpu.matmul %28, %29, %cst_9 {dimension_numbers = #tpu.dot_dimension_numbers<[1], [0], [0], [1], [0, 0, 1, 1], [], []>, precision = #tpu.contract_precision<fp32>} : vector<2x128xf32>, vector<128x128xf32>, vector<2x128xf32> -> vector<2x128xf32>
    %31 = vector.extract_strided_slice %20 {offsets = [4, 0], sizes = [2, 128], strides = [1, 1]} : vector<8x128xf32> to vector<2x128xf32>
    %32 = arith.mulf %30, %31 : vector<2x128xf32>
    %c128_10 = arith.constant 128 : index
    %c0_11 = arith.constant 0 : index
    %33 = vector.load %arg1[%c128_10, %c0_11] : memref<392x128xf32, #tpu.memory_space<vmem>>, vector<128x128xf32>
    %cst_12 = arith.constant dense<0.000000e+00> : vector<2x128xf32>
    %34 = tpu.matmul %32, %33, %cst_12 {dimension_numbers = #tpu.dot_dimension_numbers<[1], [0], [0], [1], [0, 0, 1, 1], [], []>, precision = #tpu.contract_precision<fp32>} : vector<2x128xf32>, vector<128x128xf32>, vector<2x128xf32> -> vector<2x128xf32>
    %35 = vector.extract_strided_slice %20 {offsets = [6, 0], sizes = [2, 128], strides = [1, 1]} : vector<8x128xf32> to vector<2x128xf32>
    %36 = arith.mulf %34, %35 : vector<2x128xf32>
    %c256 = arith.constant 256 : index
    %c0_13 = arith.constant 0 : index
    %37 = vector.load %arg1[%c256, %c0_13] : memref<392x128xf32, #tpu.memory_space<vmem>>, vector<128x128xf32>
    %cst_14 = arith.constant dense<0.000000e+00> : vector<2x128xf32>
    %38 = tpu.matmul %36, %37, %cst_14 {dimension_numbers = #tpu.dot_dimension_numbers<[1], [0], [0], [1], [0, 0, 1, 1], [], []>, precision = #tpu.contract_precision<fp32>} : vector<2x128xf32>, vector<128x128xf32>, vector<2x128xf32> -> vector<2x128xf32>
    %c385 = arith.constant 385 : index
    %c0_15 = arith.constant 0 : index
    %39 = vector.load %arg1[%c385, %c0_15] : memref<392x128xf32, #tpu.memory_space<vmem>>, vector<1x128xf32>
    %40 = vector.broadcast %39 : vector<1x128xf32> to vector<2x128xf32>
    %41 = arith.addf %38, %40 : vector<2x128xf32>
    %c0_16 = arith.constant 0 : index
    %c0_17 = arith.constant 0 : index
    %42 = vector.load %arg2[%c0_16, %c0_17] : memref<2x128xf32, #tpu.memory_space<vmem>>, vector<2x128xf32>
    tpu.vector_store %arg2[%c0_16, %c0_17], %41 {strides = array<i32>} : memref<2x128xf32, #tpu.memory_space<vmem>>, vector<2x128xf32>,
    return
  }
}

</mosaic_0001>

<bundles_post_ra>
// kernel: tensor_text_forward.1
= control target key start
LH: loop header
LB: loop body
LE: loop exit
PB: predicated region body
PF: predicated region fallthrough
CT: control target
= control target key end

     0   :  { %7 = vsyncpa [#allocation3], 0  ;;  %s6936_s0 = inlined_call_operand.vmem [shape: s32[8,2], index: 0, kind: input, shape index: {}]   ;;  %s6937_s1 = inlined_call_operand.hbm [shape: f32[392,128], index: 1, kind: input, shape index: {}]   ;;  %s6938_s2 = inlined_call_operand.hbm [shape: f32[2,128], index: 2, kind: output, shape index: {}]  }
   0x1   :  { %8 = vsyncpa [#allocation4], 0  ;;  %s5727_s9 = smov [#allocation2]   ;;  %s5679_s13 = scalar_lea.hbm %s6937_s1, 6272 }
   0x2   :  { %s16_s10 = sshll.u32 %s5727_s9, 4  ;;  %p5680_p0 = scmp.ne.s32.totalorder %s6937_s1, %s5679_s13  ;;  %s17_s10 = int_to_ptr.vmem [resolvable:$true] %s16_s10 }
   0x3   :  { %p5683_p1 = scmp.lt.u32.totalorder %s5679_s13, %s6937_s1 }
   0x5   :  { %p5685_p2 = pnand %p5683_p1, %p5680_p0 }
   0x7   :  { %5688 = shalt.err (!%p5685_p2)
}
   0x8   :  { %s5689_s18 = scalar_lea.vmem %s17_s10, 6272  ;;  %p5694_p4 = scmp.lt.s32.totalorder %s17_s10, %s17_s10 }
   0x9   :  { %p5690_p3 = scmp.ne.s32.totalorder %s17_s10, %s5689_s18  ;;  %p5695_p5 = scmp.lt.s32.totalorder %s5689_s18, %s5689_s18 }
   0xb   :  { %p5696_p6 = por %p5695_p5, %p5694_p4 }
   0xd   :  { %p5697_p7 = pnand %p5696_p6, %p5690_p3 }
   0xf   :  { %5700 = shalt.err (!%p5697_p7)
}
  0x10   :  { %s5728_s19 = smov 128   ;;  %s5729_s20 = smov 8  }
  0x11   :  { %22 = dma.hbm_to_vmem [thread:$0]  %s6937_s1, 6272, %s17_s10, [#allocation3], %s5728_s19, %s5728_s19, %s5729_s20  }
  0x12   :  { %5723 = dma.done.wait [#allocation3], 6272  }
  0x13   :  { %5724 = vsyncadd [#allocation3], 4294961024  ;;  %v5730_v0 = vmov 0   ;;  %v5731_v1 = vmov 0.0|0.0   ;;  %v26_v2 = vld [vmem:[%s6936_s0] sm:$0xff]  ;;  %v45_v4 = vld [vmem:[#allocation2 + $0x8] sm:$0xff] }
  0x14   :  { %5677 = vset.pattern.permute.xlu0 %v5730_v0  ;;  %4970 = vmatprep.subr.bf16.mxu0 %v5731_v1  ;;  %v44_v3 = vld [vmem:[#allocation2] sm:$0xff]  ;;  %v36_v5 = vadd.s32 50, %v26_v2  ;;  %v64_v7 = vand.u32 4294901760, %v45_v4  ;;  %v46_v8 = vld [vmem:[#allocation2 + $0x10] sm:$0xff]  ;;  %v47_v9 = vld [vmem:[#allocation2 + $0x18] sm:$0xff]  ;;  %v5732_v28 = vmov 1  }
  0x15   :  { %4898 = vmatprep.subr.bf16.mxu1 %v5731_v1  ;;  %30 = vperm.xlu0 %5677, %v26_v2   ;;  %v61_v6 = vand.u32 4294901760, %v44_v3  ;;  %v48_v10 = vld [vmem:[#allocation2 + $0x20] sm:$0xff]  ;;  %v67_v11 = vand.u32 4294901760, %v46_v8  ;;  %v70_v12 = vand.u32 4294901760, %v47_v9  ;;  %v49_v13 = vld [vmem:[#allocation2 + $0x28] sm:$0xff]  ;;  %v50_v15 = vld [vmem:[#allocation2 + $0x30] sm:$0xff] }
  0x16   :  { %v73_v14 = vand.u32 4294901760, %v48_v10  ;;  %v51_v16 = vld [vmem:[#allocation2 + $0x38] sm:$0xff]  ;;  %v5772_v19 = vsub.f32 %v45_v4, %v64_v7  ;;  %v76_v20 = vand.u32 4294901760, %v49_v13  ;;  %v52_v21 = vld [vmem:[#allocation2 + $0x40] sm:$0xff]  ;;  %v53_v22 = vld [vmem:[#allocation2 + $0x48] sm:$0xff]  ;;  %v79_v31 = vand.u32 4294901760, %v50_v15 }
  0x17   :  { %v5768_v17 = vpack.c.bf16 %v64_v7, %v61_v6  ;;  %v5770_v18 = vsub.f32 %v44_v3, %v61_v6  ;;  %v5774_v23 = vsub.f32 %v46_v8, %v67_v11  ;;  %v5776_v24 = vsub.f32 %v47_v9, %v70_v12  ;;  %v5780_v26 = vld [vmem:[#allocation2 + $0x50] sm:$0xff]  ;;  %v5782_v27 = vld [vmem:[#allocation2 + $0x58] sm:$0xff]  ;;  %v5797_v39 = vld [vmem:[#allocation2 + $0x60] sm:$0xff]  ;;  %s5735_s0 = smov [#allocation5]  }
  0x18   :  { %v5778_v25 = vsub.f32 %v48_v10, %v73_v14  ;;  %v5785_v29 = vpack.c.bf16 %v70_v12, %v67_v11  ;;  %v5787_v30 = vsub.f32 %v49_v13, %v76_v20  ;;  %v82_v32 = vand.u32 4294901760, %v51_v16  ;;  %v57_v40 = vld [vmem:[#allocation2 + $0x68] sm:$0xff]  ;;  %v5799_v41 = vld [vmem:[#allocation2 + $0x70] sm:$0xff]  ;;  %v5806_v44 = vld [vmem:[#allocation2 + $0x78] sm:$0xff]  ;;  %s3325_s1 = sshll.u32 %s5735_s0, 4  ;;  %s3326_s1 = int_to_ptr.vmem [resolvable:$true] %s3325_s1 }
  0x19   :  { %5678 = vset.pattern.permute.xlu0 %v5732_v28  ;;  %4972 = vmatpush3.bf16.msra.mxu0 %v5768_v17  ;;  %v85_v33 = vand.u32 4294901760, %v52_v21  ;;  %v88_v34 = vand.u32 4294901760, %v53_v22  ;;  %v5791_v35 = vsub.f32 %v50_v15, %v79_v31  ;;  %v91_v37 = vand.u32 4294901760, %v5780_v26  ;;  %s5701_s25 = scalar_lea.vmem %s3326_s1, 32  ;;  %p5706_p9 = scmp.lt.s32.totalorder %s3326_s1, %s3326_s1 }
  0x1a   :  { %38 = vperm.xlu0 %5678, %v36_v5   ;;  %4973 = vmatprep.subr.bf16.mxu0 %v5731_v1  ;;  %v5793_v36 = vsub.f32 %v51_v16, %v82_v32  ;;  %v94_v38 = vand.u32 4294901760, %v5782_v27  ;;  %v5809_v45 = vpack.c.bf16 %v76_v20, %v73_v14  ;;  %v97_v48 = vand.u32 4294901760, %v5797_v39  ;;  %p5702_p8 = scmp.ne.s32.totalorder %s3326_s1, %s5701_s25  ;;  %p5707_p10 = scmp.lt.s32.totalorder %s5701_s25, %s5701_s25 }
  0x1b   :  { %4900 = vmatpush3.bf16.msra.mxu1 %v5768_v17  ;;  %v5802_v42 = vsub.f32 %v52_v21, %v85_v33  ;;  %v5804_v43 = vsub.f32 %v53_v22, %v88_v34  ;;  %v5812_v46 = vsub.f32 %v5780_v26, %v91_v37  ;;  %v100_v49 = vand.u32 4294901760, %v57_v40 }
  0x1c   :  { %4901 = vmatprep.subr.bf16.mxu1 %v5731_v1  ;;  %v5815_v47 = vsub.f32 %v5782_v27, %v94_v38  ;;  %v103_v50 = vand.u32 4294901760, %v5799_v41  ;;  %v106_v51 = vand.u32 4294901760, %v5806_v44  ;;  %v5823_v52 = vpack.c.bf16 %v82_v32, %v79_v31  ;;  %p5708_p11 = por %p5707_p10, %p5706_p9 }
  0x1d   :  { %4975 = vmatpush3.bf16.msra.mxu0 %v5785_v29  ;;  %v5826_v53 = vsub.f32 %v5797_v39, %v97_v48  ;;  %v5828_v54 = vsub.f32 %v57_v40, %v100_v49  ;;  %v154_v57 = vand.u32 4294901760, %v5770_v18  ;;  %v161_v58 = vand.u32 4294901760, %v5772_v19 }
  0x1e   :  { %4976 = vmatprep.subr.bf16.mxu0 %v5731_v1  ;;  %v5831_v55 = vsub.f32 %v5799_v41, %v103_v50  ;;  %v5835_v56 = vsub.f32 %v5806_v44, %v106_v51  ;;  %vm5733_vm0 = vmmov 0   ;;  %v5734_v59 = vmov 0.0   ;;  %p5709_p12 = pnand %p5708_p11, %p5702_p8 }
  0x1f   :  { %4903 = vmatpush3.bf16.msra.mxu1 %v5785_v29  ;;  %3985 = vmatprep.mubr.msk.f32.mxu0 %vm5733_vm0, %v5734_v59  ;;  %v5843_v60 = vpack.c.bf16 %v161_v58, %v154_v57  ;;  %v155_v61 = vsub.f32 %v5770_v18, %v154_v57  ;;  %v162_v62 = vsub.f32 %v5772_v19, %v161_v58  ;;  %v168_v3 = vand.u32 4294901760, %v5774_v23 }
  0x20   :  { %4904 = vmatprep.subr.bf16.mxu1 %v5731_v1  ;;  %3880 = vmatprep.mubr.msk.f32.mxu1 %vm5733_vm0, %v5734_v59  ;;  %v5850_v63 = vpack.c.bf16 %v88_v34, %v85_v33  ;;  %v175_v4 = vand.u32 4294901760, %v5776_v24  ;;  %v5864_v9 = vpack.c.bf16 %v94_v38, %v91_v37  ;;  %v182_v12 = vand.u32 4294901760, %v5778_v25 }
  0x21   :  { %4978 = vmatpush3.bf16.msra.mxu0 %v5809_v45  ;;  %v156_v0 = vand.u32 4294901760, %v155_v61  ;;  %v163_v2 = vand.u32 4294901760, %v162_v62  ;;  %v169_v7 = vsub.f32 %v5774_v23, %v168_v3  ;;  %v189_v13 = vand.u32 4294901760, %v5787_v30 }
  0x22   :  { %4979 = vmatprep.subr.bf16.mxu0 %v5731_v1  ;;  %v5859_v6 = vpack.c.bf16 %v175_v4, %v168_v3  ;;  %v176_v8 = vsub.f32 %v5776_v24, %v175_v4  ;;  %v183_v16 = vsub.f32 %v5778_v25, %v182_v12  ;;  %v5878_v21 = vpack.c.bf16 %v100_v49, %v97_v48 }
  0x23   :  { %4906 = vmatpush3.bf16.msra.mxu1 %v5809_v45  ;;  %v5857_v5 = vpack.c.bf16 %v163_v2, %v156_v0  ;;  %v170_v10 = vand.u32 4294901760, %v169_v7  ;;  %v5873_v15 = vpack.c.bf16 %v189_v13, %v182_v12  ;;  %v190_v20 = vsub.f32 %v5787_v30, %v189_v13 }
  0x24   :  { %4907 = vmatprep.subr.bf16.mxu1 %v5731_v1  ;;  %v177_v11 = vand.u32 4294901760, %v176_v8  ;;  %v184_v22 = vand.u32 4294901760, %v183_v16  ;;  %v196_v27 = vand.u32 4294901760, %v5791_v35  ;;  %v203_v28 = vand.u32 4294901760, %v5793_v36 }
  0x25   :  { %4981 = vmatpush3.bf16.msra.mxu0 %v5823_v52  ;;  %v191_v26 = vand.u32 4294901760, %v190_v20  ;;  %v5892_v37 = vpack.c.bf16 %v106_v51, %v103_v50  ;;  %v210_v40 = vand.u32 4294901760, %v5802_v42  ;;  %v217_v41 = vand.u32 4294901760, %v5804_v43 }
  0x26   :  { %4982 = vmatprep.subr.bf16.mxu0 %v5731_v1  ;;  %v5871_v14 = vpack.c.bf16 %v177_v11, %v170_v10  ;;  %v5887_v32 = vpack.c.bf16 %v203_v28, %v196_v27  ;;  %v197_v33 = vsub.f32 %v5791_v35, %v196_v27  ;;  %v204_v34 = vsub.f32 %v5793_v36, %v203_v28 }
  0x27   :  { %4909 = vmatpush3.bf16.msra.mxu1 %v5823_v52  ;;  %v5885_v31 = vpack.c.bf16 %v191_v26, %v184_v22  ;;  %v5901_v48 = vpack.c.bf16 %v217_v41, %v210_v40  ;;  %v211_v49 = vsub.f32 %v5802_v42, %v210_v40  ;;  %v218_v50 = vsub.f32 %v5804_v43, %v217_v41 }
  0x28   :  { %4910 = vmatprep.subr.bf16.mxu1 %v5731_v1  ;;  %v198_v38 = vand.u32 4294901760, %v197_v33  ;;  %v205_v39 = vand.u32 4294901760, %v204_v34  ;;  %v224_v58 = vand.u32 4294901760, %v5812_v46  ;;  %v231_v61 = vand.u32 4294901760, %v5815_v47 }
  0x29   :  { %4984 = vmatpush3.bf16.msra.mxu0 %v5850_v63  ;;  %v212_v51 = vand.u32 4294901760, %v211_v49  ;;  %v219_v57 = vand.u32 4294901760, %v218_v50  ;;  %v238_v8 = vand.u32 4294901760, %v5826_v53  ;;  %v245_v10 = vand.u32 4294901760, %v5828_v54 }
  0x2a   :  { %4985 = vmatprep.subr.bf16.mxu0 %v5731_v1  ;;  %v5899_v44 = vpack.c.bf16 %v205_v39, %v198_v38  ;;  %v5913_v0 = vpack.c.bf16 %v231_v61, %v224_v58  ;;  %v225_v2 = vsub.f32 %v5812_v46, %v224_v58  ;;  %v232_v3 = vsub.f32 %v5815_v47, %v231_v61 }
  0x2b   :  { %4912 = vmatpush3.bf16.msra.mxu1 %v5850_v63  ;;  %v5911_v62 = vpack.c.bf16 %v219_v57, %v212_v51  ;;  %v5013_v12 = vpack.c.bf16 %v245_v10, %v238_v8  ;;  %v239_v13 = vsub.f32 %v5826_v53, %v238_v8  ;;  %v246_v16 = vsub.f32 %v5828_v54, %v245_v10 }
  0x2c   :  { %4913 = vmatprep.subr.bf16.mxu1 %v5731_v1  ;;  %v226_v4 = vand.u32 4294901760, %v225_v2  ;;  %v233_v7 = vand.u32 4294901760, %v232_v3  ;;  %v252_v26 = vand.u32 4294901760, %v5831_v55  ;;  %v259_v27 = vand.u32 4294901760, %v5835_v56 }
  0x2d   :  { %4987 = vmatpush3.bf16.msra.mxu0 %v5864_v9  ;;  %v240_v20 = vand.u32 4294901760, %v239_v13  ;;  %v247_v22 = vand.u32 4294901760, %v246_v16  ;;  %v4947_v49 = vpack.c.bf16 %v5772_v19, %v5770_v18  ;;  %v4950_v50 = vpack.c.bf16 %v5776_v24, %v5774_v23  ;;  %v6019_v23 = vld [vmem:[#allocation2 + $0x88] sm:$0xff] }
  0x2e   :  { %4988 = vmatprep.subr.bf16.mxu0 %v5731_v1  ;;  %v4938_v11 = vpack.c.bf16 %v233_v7, %v226_v4  ;;  %v5016_v33 = vpack.c.bf16 %v259_v27, %v252_v26  ;;  %v253_v34 = vsub.f32 %v5831_v55, %v252_v26  ;;  %v260_v38 = vsub.f32 %v5835_v56, %v259_v27 }
  0x2f   :  { %4915 = vmatpush3.bf16.msra.mxu1 %v5864_v9  ;;  %v4941_v28 = vpack.c.bf16 %v247_v22, %v240_v20  ;;  %v4953_v51 = vpack.c.bf16 %v5787_v30, %v5778_v25  ;;  %v4956_v57 = vpack.c.bf16 %v5793_v36, %v5791_v35  ;;  %v4959_v58 = vpack.c.bf16 %v5804_v43, %v5802_v42  ;;  %v6035_v30 = vld [vmem:[#allocation2 + $0x98] sm:$0xff]  ;;  %v6051_v43 = vld [vmem:[#allocation2 + $0xa0] sm:$0xff] }
  0x30   :  { %4916 = vmatprep.subr.bf16.mxu1 %v5731_v1  ;;  %v254_v39 = vand.u32 4294901760, %v253_v34  ;;  %v261_v40 = vand.u32 4294901760, %v260_v38  ;;  %v4962_v61 = vpack.c.bf16 %v5815_v47, %v5812_v46  ;;  %v4965_v2 = vpack.c.bf16 %v5828_v54, %v5826_v53  ;;  %v6070_v53 = vld [vmem:[#allocation2 + $0xb0] sm:$0xff]  ;;  %v6072_v54 = vld [vmem:[#allocation2 + $0xb8] sm:$0xff] }
  0x31   :  { %4990 = vmatpush3.bf16.msra.mxu0 %v5878_v21  ;;  %v4968_v18 = vpack.c.bf16 %v5835_v56, %v5831_v55  ;;  %v27_v19 = vlaneseq  ;;  %v727_v25 = vand.u32 4294901760, %v6019_v23  ;;  %v733_v42 = vand.u32 4294901760, %v6035_v30 }
  0x32   :  { %4991 = vmatprep.subr.bf16.mxu0 %v5731_v1  ;;  %v4944_v41 = vpack.c.bf16 %v261_v40, %v254_v39  ;;  %v736_v47 = vand.u32 4294901760, %v6051_v43  ;;  %v742_v56 = vand.u32 4294901760, %v6070_v53 }
  0x33   :  { %4918 = vmatpush3.bf16.msra.mxu1 %v5878_v21  ;;  %v28_v3 = vand.u32 127, %v27_v19 }
  0x34   :  { %4919 = vmatprep.subr.bf16.mxu1 %v5731_v1 }
  0x35   :  { %4993 = vmatpush3.bf16.msra.mxu0 %v5892_v37 }
  0x36   :  { %4994 = vmatprep.subr.bf16.mxu0 %v5731_v1 }
  0x37   :  { %4921 = vmatpush3.bf16.msra.mxu1 %v5892_v37 }
  0x38   :  { %4922 = vmatprep.subr.bf16.mxu1 %v5731_v1 }
  0x94   :  { %v31_v4 = vpop.permute.xlu0 %30 }
  0x95   :  { %vm32_vm1 = vcmp.eq.s32.totalorder %v28_v3, %v31_v4 }
  0x96   :  { %v3334_v8 = vsel %vm32_vm1, 1.0, %v5734_v59 }
  0x99   :  { %v39_v7 = vpop.permute.xlu0 %38 }
  0x9a   :  { %vm40_vm2 = vcmp.eq.s32.totalorder %v28_v3, %v39_v7 }
  0x9b   :  { %v3335_v10 = vsel %vm40_vm2, 1.0, %v5734_v59 }
  0x9c   :  { %v43_v13 = vadd.f32 %v3335_v10, %v3334_v8 }
  0x9e   :  { %v5944_v16 = vand.u32 4294901760, %v43_v13 }
  0xa0   :  { %v5947_v20 = vsub.f32 %v43_v13, %v5944_v16 }
  0xa2   :  { %v143_v22 = vand.u32 4294901760, %v5947_v20 }
  0xa4   :  { %3986 = vmatmul.mubr.f32.vlgmr.msra.gmra.mrb[0].mxu0 %v143_v22  ;;  %v144_v26 = vsub.f32 %v5947_v20, %v143_v22 }
  0xa5   :  { %4996 = vmatpush3.bf16.msra.mxu0 %v5843_v60  ;;  %4020 = vmatprep.mubr.msk.f32.mxu0 %vm5733_vm0, %v5734_v59  ;;  %v745_v60 = vand.u32 4294901760, %v6072_v54 }
  0xa6   :  { %4997 = vmatprep.subr.bf16.mxu0 %v5731_v1  ;;  %v145_v27 = vand.u32 4294901760, %v144_v26 }
  0xa8   :  { %3881 = vmatmul.mubr.f32.vlgmr.msra.gmra.mrb[0].mxu1 %v145_v27 }
  0xa9   :  { %4924 = vmatpush3.bf16.msra.mxu1 %v5857_v5  ;;  %4999 = vmatpush3.bf16.msra.mxu0 %v5859_v6  ;;  %v715_v5 = vld [vmem:[#allocation2 + $0xc0] sm:$0xff]  ;;  %v716_v6 = vld [vmem:[#allocation2 + $0xc8] sm:$0xff] }
  0xaa   :  { %4925 = vmatprep.subr.bf16.mxu1 %v5731_v1  ;;  %5000 = vmatprep.subr.bf16.mxu0 %v5731_v1 }
  0xab   :  { %3915 = vmatprep.mubr.msk.f32.mxu1 %vm5733_vm0, %v5734_v59 }
  0xad   :  { %4927 = vmatpush3.bf16.msra.mxu1 %v5871_v14  ;;  %5002 = vmatpush3.bf16.msra.mxu0 %v5873_v15  ;;  %v751_v14 = vand.u32 4294901760, %v716_v6 }
  0xae   :  { %4928 = vmatprep.subr.bf16.mxu1 %v5731_v1  ;;  %5003 = vmatprep.subr.bf16.mxu0 %v5731_v1 }
  0xb1   :  { %4930 = vmatpush3.bf16.msra.mxu1 %v5885_v31  ;;  %5005 = vmatpush3.bf16.msra.mxu0 %v5887_v32  ;;  %v718_v31 = vld [vmem:[#allocation2 + $0xd8] sm:$0xff] }
  0xb2   :  { %4931 = vmatprep.subr.bf16.mxu1 %v5731_v1  ;;  %5006 = vmatprep.subr.bf16.mxu0 %v5731_v1 }
  0xb5   :  { %4933 = vmatpush3.bf16.msra.mxu1 %v5899_v44  ;;  %5008 = vmatpush3.bf16.msra.mxu0 %v5901_v48  ;;  %v719_v48 = vld [vmem:[#allocation2 + $0xe0] sm:$0xff] }
  0xb6   :  { %4934 = vmatprep.subr.bf16.mxu1 %v5731_v1  ;;  %5009 = vmatprep.subr.bf16.mxu0 %v5731_v1 }
  0xb9   :  { %4936 = vmatpush3.bf16.msra.mxu1 %v5911_v62  ;;  %5011 = vmatpush3.bf16.msra.mxu0 %v5913_v0  ;;  %v720_v62 = vld [vmem:[#allocation2 + $0xe8] sm:$0xff]  ;;  %v760_v0 = vand.u32 4294901760, %v719_v48 }
  0xba   :  { %4937 = vmatprep.subr.bf16.mxu1 %v5731_v1  ;;  %5012 = vmatprep.subr.bf16.mxu0 %v5731_v1 }
  0xbb   :  { %v6153_v10 = vsub.f32 %v719_v48, %v760_v0 }
  0xbd   :  { %4939 = vmatpush3.bf16.msra.mxu1 %v4938_v11  ;;  %5014 = vmatpush3.bf16.msra.mxu0 %v5013_v12  ;;  %v763_v11 = vand.u32 4294901760, %v720_v62  ;;  %v901_v22 = vand.u32 4294901760, %v6153_v10 }
  0xbe   :  { %4940 = vmatprep.subr.bf16.mxu1 %v5731_v1  ;;  %5015 = vmatprep.subr.bf16.mxu0 %v5731_v1 }
  0xbf   :  { %v6115_v12 = vpack.c.bf16 %v763_v11, %v760_v0  ;;  %v6155_v13 = vsub.f32 %v720_v62, %v763_v11 }
  0xc1   :  { %4942 = vmatpush3.bf16.msra.mxu1 %v4941_v28  ;;  %5017 = vmatpush3.bf16.msra.mxu0 %v5016_v33  ;;  %v721_v28 = vld [vmem:[#allocation2 + $0xf0] sm:$0xff]  ;;  %v722_v33 = vld [vmem:[#allocation2 + $0xf8] sm:$0xff]  ;;  %v908_v26 = vand.u32 4294901760, %v6155_v13 }
  0xc2   :  { %4943 = vmatprep.subr.bf16.mxu1 %v5731_v1  ;;  %5018 = vmatprep.subr.bf16.mxu0 %v5731_v1  ;;  %v766_v34 = vand.u32 4294901760, %v721_v28  ;;  %v769_v38 = vand.u32 4294901760, %v722_v33 }
  0xc4   :  { %4021 = vmatmul.mubr.f32.vlgmr.msra.gmra.mrb[0].mxu0 %v5944_v16  ;;  %v6121_v39 = vpack.c.bf16 %v769_v38, %v766_v34 }
  0xc5   :  { %4945 = vmatpush3.bf16.msra.mxu1 %v4944_v41  ;;  %5020 = vmatpush3.bf16.msra.mxu0 %v5768_v17  ;;  %v6017_v17 = vld [vmem:[#allocation2 + $0x80] sm:$0xff]  ;;  %v6129_v41 = vsub.f32 %v716_v6, %v751_v14  ;;  %v6164_v6 = vsub.f32 %v721_v28, %v766_v34 }
  0xc6   :  { %4946 = vmatprep.subr.bf16.mxu1 %v5731_v1  ;;  %5021 = vmatprep.subr.bf16.mxu0 %v5731_v1  ;;  %v724_v24 = vand.u32 4294901760, %v6017_v17 }
  0xc7   :  { %4055 = vmatprep.mubr.msk.f32.mxu0 %vm5733_vm0, %v5734_v59 }
  0xc8   :  { %3916 = vmatmul.mubr.f32.vlgmr.msra.gmra.mrb[0].mxu1 %v5944_v16  ;;  %v6043_v35 = vpack.c.bf16 %v727_v25, %v724_v24 }
  0xc9   :  { %4948 = vmatpush3.bf16.msra.mxu1 %v4947_v49  ;;  %5023 = vmatpush3.bf16.msra.mxu0 %v5785_v29  ;;  %v6033_v29 = vld [vmem:[#allocation2 + $0x90] sm:$0xff] }
  0xca   :  { %4949 = vmatprep.subr.bf16.mxu1 %v5731_v1  ;;  %5024 = vmatprep.subr.bf16.mxu0 %v5731_v1  ;;  %v730_v36 = vand.u32 4294901760, %v6033_v29 }
  0xcb   :  { %3950 = vmatprep.mubr.msk.f32.mxu1 %vm5733_vm0, %v5734_v59 }
  0xcc   :  { %v6065_v46 = vpack.c.bf16 %v733_v42, %v730_v36 }
  0xcd   :  { %4951 = vmatpush3.bf16.msra.mxu1 %v4950_v50  ;;  %5026 = vmatpush3.bf16.msra.mxu0 %v5809_v45  ;;  %v6053_v45 = vld [vmem:[#allocation2 + $0xa8] sm:$0xff]  ;;  %v880_v50 = vand.u32 4294901760, %v6129_v41 }
  0xce   :  { %4952 = vmatprep.subr.bf16.mxu1 %v5731_v1  ;;  %5027 = vmatprep.subr.bf16.mxu0 %v5731_v1 }
  0xd1   :  { %4954 = vmatpush3.bf16.msra.mxu1 %v4953_v51  ;;  %5029 = vmatpush3.bf16.msra.mxu0 %v5823_v52  ;;  %v739_v52 = vand.u32 4294901760, %v6053_v45 }
  0xd2   :  { %4955 = vmatprep.subr.bf16.mxu1 %v5731_v1  ;;  %5030 = vmatprep.subr.bf16.mxu0 %v5731_v1 }
  0xd3   :  { %v6083_v55 = vpack.c.bf16 %v739_v52, %v736_v47 }
  0xd5   :  { %4957 = vmatpush3.bf16.msra.mxu1 %v4956_v57  ;;  %5032 = vmatpush3.bf16.msra.mxu0 %v5850_v63  ;;  %v6095_v63 = vpack.c.bf16 %v745_v60, %v742_v56  ;;  %v881_v57 = vsub.f32 %v6129_v41, %v880_v50 }
  0xd6   :  { %4958 = vmatprep.subr.bf16.mxu1 %v5731_v1  ;;  %5033 = vmatprep.subr.bf16.mxu0 %v5731_v1 }
  0xd9   :  { %4960 = vmatpush3.bf16.msra.mxu1 %v4959_v58  ;;  %5035 = vmatpush3.bf16.msra.mxu0 %v5864_v9  ;;  %v748_v9 = vand.u32 4294901760, %v715_v5 }
  0xda   :  { %4961 = vmatprep.subr.bf16.mxu1 %v5731_v1  ;;  %5036 = vmatprep.subr.bf16.mxu0 %v5731_v1 }
  0xdb   :  { %v6103_v15 = vpack.c.bf16 %v751_v14, %v748_v9  ;;  %v6127_v40 = vsub.f32 %v715_v5, %v748_v9  ;;  %v902_v5 = vsub.f32 %v6153_v10, %v901_v22  ;;  %v6166_v9 = vsub.f32 %v722_v33, %v769_v38 }
  0xdc   :  { %v909_v14 = vsub.f32 %v6155_v13, %v908_v26 }
  0xdd   :  { %4963 = vmatpush3.bf16.msra.mxu1 %v4962_v61  ;;  %5038 = vmatpush3.bf16.msra.mxu0 %v5878_v21  ;;  %v717_v21 = vld [vmem:[#allocation2 + $0xd0] sm:$0xff]  ;;  %v873_v49 = vand.u32 4294901760, %v6127_v40  ;;  %v6185_v34 = vpack.c.bf16 %v6129_v41, %v6127_v40  ;;  %v6945_v41 = vand.u32 4294901760, %v6164_v6 }
  0xde   :  { %4964 = vmatprep.subr.bf16.mxu1 %v5731_v1  ;;  %5039 = vmatprep.subr.bf16.mxu0 %v5731_v1  ;;  %v754_v32 = vand.u32 4294901760, %v717_v21 }
  0xdf   :  { %v874_v51 = vsub.f32 %v6127_v40, %v873_v49  ;;  %v6418_v40 = vpack.c.bf16 %v908_v26, %v901_v22 }
  0xe0   :  { %v6139_v58 = vsub.f32 %v717_v21, %v754_v32  ;;  %v903_v21 = vand.u32 4294901760, %v902_v5  ;;  %v6214_v5 = vsub.f32 %v6033_v29, %v730_v36 }
  0xe1   :  { %4966 = vmatpush3.bf16.msra.mxu1 %v4965_v2  ;;  %5041 = vmatpush3.bf16.msra.mxu0 %v5892_v37  ;;  %v757_v37 = vand.u32 4294901760, %v718_v31  ;;  %v875_v2 = vand.u32 4294901760, %v874_v51  ;;  %v6193_v51 = vpack.c.bf16 %v6155_v13, %v6153_v10 }
  0xe2   :  { %4967 = vmatprep.subr.bf16.mxu1 %v5731_v1  ;;  %5186 = vmatprep.subr.bf16.mxu0 %v5731_v1  ;;  %v887_v19 = vand.u32 4294901760, %v6139_v58  ;;  %v831_v36 = vand.u32 4294901760, %v6214_v5 }
  0xe3   :  { %v6109_v44 = vpack.c.bf16 %v757_v37, %v754_v32  ;;  %v6141_v61 = vsub.f32 %v718_v31, %v757_v37  ;;  %v6940_v31 = vand.u32 4294901760, %v6164_v6  ;;  %v6939_v32 = vand.u32 4294901760, %v6166_v9 }
  0xe4   :  { %4056 = vmatmul.mubr.f32.vlgmr.msra.gmra.mrb[0].mxu0 %v5944_v16  ;;  %v888_v7 = vsub.f32 %v6139_v58, %v887_v19  ;;  %v910_v37 = vand.u32 4294901760, %v909_v14  ;;  %v3336_v14 = vld [vmem:[#allocation2 + $0x180] ss:$0 sm:$0xff] }
  0xe5   :  { %4969 = vmatpush3.bf16.msra.mxu1 %v4968_v18  ;;  %5188 = vmatpush3.bf16.msra.mxu0 %v6043_v35  ;;  %v882_v18 = vand.u32 4294901760, %v881_v57  ;;  %v894_v3 = vand.u32 4294901760, %v6141_v61  ;;  %v916_v48 = vsub.f32 %v6164_v6, %v6940_v31  ;;  %v923_v62 = vsub.f32 %v6166_v9, %v6939_v32 }
  0xe6   :  { %5042 = vmatprep.subr.bf16.mxu1 %v5731_v1  ;;  %5189 = vmatprep.subr.bf16.mxu0 %v5731_v1  ;;  %v889_v16 = vand.u32 4294901760, %v888_v7  ;;  %v6179_v0 = vpack.c.bf16 %v910_v37, %v903_v21  ;;  %v6189_v38 = vpack.c.bf16 %v6141_v61, %v6139_v58  ;;  %v6197_v57 = vpack.c.bf16 %v6166_v9, %v6164_v6 }
  0xe7   :  { %4300 = vmatprep.mubr.msk.f32.mxu0 %vm5733_vm0, %v5734_v59  ;;  %v6145_v4 = vpack.c.bf16 %v882_v18, %v875_v2  ;;  %v895_v8 = vsub.f32 %v6141_v61, %v894_v3  ;;  %v917_v11 = vand.u32 4294901760, %v916_v48  ;;  %v924_v28 = vand.u32 4294901760, %v923_v62 }
  0xe8   :  { %3951 = vmatmul.mubr.f32.vlgmr.msra.gmra.mrb[0].mxu1 %v5947_v20  ;;  %v6202_v2 = vsub.f32 %v6017_v17, %v724_v24  ;;  %v6207_v18 = vsub.f32 %v6019_v23, %v727_v25  ;;  %v6219_v17 = vsub.f32 %v6035_v30, %v733_v42  ;;  %v6235_v42 = vsub.f32 %v6051_v43, %v736_v47 }
  0xe9   :  { %5044 = vmatpush3.bf16.msra.mxu1 %v6043_v35  ;;  %4090 = vmatprep.mubr.msk.f32.mxu1 %vm5733_vm0, %v5734_v59  ;;  %v896_v20 = vand.u32 4294901760, %v895_v8  ;;  %v6181_v33 = vpack.c.bf16 %v924_v28, %v917_v11  ;;  %v6240_v48 = vsub.f32 %v6053_v45, %v739_v52  ;;  %v6258_v52 = vsub.f32 %v6070_v53, %v742_v56 }
  0xea   :  { %5045 = vmatprep.subr.bf16.mxu1 %v5731_v1  ;;  %5191 = vmatpush3.bf16.msra.mxu0 %v6065_v46  ;;  %v838_v30 = vand.u32 4294901760, %v6219_v17  ;;  %v845_v47 = vand.u32 4294901760, %v6235_v42 }
  0xeb   :  { %5192 = vmatprep.subr.bf16.mxu0 %v5731_v1  ;;  %v6159_v27 = vpack.c.bf16 %v896_v20, %v889_v16  ;;  %v817_v16 = vand.u32 4294901760, %v6202_v2  ;;  %v824_v20 = vand.u32 4294901760, %v6207_v18  ;;  %v852_v45 = vand.u32 4294901760, %v6240_v48 }
  0xec   :  { %v839_v43 = vsub.f32 %v6219_v17, %v838_v30  ;;  %v846_v53 = vsub.f32 %v6235_v42, %v845_v47 }
  0xed   :  { %5047 = vmatpush3.bf16.msra.mxu1 %v6065_v46  ;;  %v818_v21 = vsub.f32 %v6202_v2, %v817_v16  ;;  %v825_v29 = vsub.f32 %v6207_v18, %v824_v20  ;;  %v853_v56 = vsub.f32 %v6240_v48, %v852_v45 }
  0xee   :  { %5048 = vmatprep.subr.bf16.mxu1 %v5731_v1  ;;  %5194 = vmatpush3.bf16.msra.mxu0 %v6083_v55 }
  0xef   :  { %5195 = vmatprep.subr.bf16.mxu0 %v5731_v1  ;;  %v819_v11 = vand.u32 4294901760, %v818_v21 }
  0xf1   :  { %5050 = vmatpush3.bf16.msra.mxu1 %v6083_v55 }
  0xf2   :  { %5051 = vmatprep.subr.bf16.mxu1 %v5731_v1  ;;  %5197 = vmatpush3.bf16.msra.mxu0 %v6095_v63 }
  0xf3   :  { %5198 = vmatprep.subr.bf16.mxu0 %v5731_v1 }
  0xf5   :  { %5053 = vmatpush3.bf16.msra.mxu1 %v6095_v63 }
  0xf6   :  { %5054 = vmatprep.subr.bf16.mxu1 %v5731_v1  ;;  %5200 = vmatpush3.bf16.msra.mxu0 %v6103_v15 }
  0xf7   :  { %5201 = vmatprep.subr.bf16.mxu0 %v5731_v1 }
  0xf9   :  { %5056 = vmatpush3.bf16.msra.mxu1 %v6103_v15 }
  0xfa   :  { %5057 = vmatprep.subr.bf16.mxu1 %v5731_v1  ;;  %5203 = vmatpush3.bf16.msra.mxu0 %v6109_v44 }
  0xfb   :  { %5204 = vmatprep.subr.bf16.mxu0 %v5731_v1 }
  0xfd   :  { %5059 = vmatpush3.bf16.msra.mxu1 %v6109_v44 }
  0xfe   :  { %5060 = vmatprep.subr.bf16.mxu1 %v5731_v1  ;;  %5206 = vmatpush3.bf16.msra.mxu0 %v6115_v12 }
  0xff   :  { %5207 = vmatprep.subr.bf16.mxu0 %v5731_v1 }
 0x101   :  { %5062 = vmatpush3.bf16.msra.mxu1 %v6115_v12 }
 0x102   :  { %5063 = vmatprep.subr.bf16.mxu1 %v5731_v1  ;;  %5209 = vmatpush3.bf16.msra.mxu0 %v6121_v39 }
 0x103   :  { %5210 = vmatprep.subr.bf16.mxu0 %v5731_v1 }
 0x105   :  { %5065 = vmatpush3.bf16.msra.mxu1 %v6121_v39 }
 0x106   :  { %5066 = vmatprep.subr.bf16.mxu1 %v5731_v1 }
 0x1b7   :  { %v697_v7 = vpop.f32.mrb[0].mxu0 }
 0x1b8   :  { %v4057_v8 = vpop.f32.mrb[1].mxu0 }
 0x1b9   :  { %v832_v8 = vsub.f32 %v6214_v5, %v831_v36 }
 0x1bb   :  { %v402_v24 = vpop.f32.mrb[0].mxu1 }
 0x1bc   :  { %v6221_v23 = vadd.f32 %v697_v7, %v402_v24  ;;  %v3952_v25 = vpop.f32.mrb[1].mxu1  ;;  %v826_v7 = vand.u32 4294901760, %v825_v29  ;;  %v6263_v24 = vsub.f32 %v6072_v54, %v745_v60  ;;  %v840_v29 = vand.u32 4294901760, %v839_v43 }
 0x1bd   :  { %v859_v54 = vand.u32 4294901760, %v6258_v52 }
 0x1be   :  { %v706_v37 = vmul.f32 %v6221_v23, %v3336_v14  ;;  %v6269_v21 = vpack.c.bf16 %v826_v7, %v819_v11  ;;  %v866_v60 = vand.u32 4294901760, %v6263_v24  ;;  %v847_v11 = vand.u32 4294901760, %v846_v53 }
 0x1bf   :  { %v854_v7 = vand.u32 4294901760, %v853_v56  ;;  %v6310_v53 = vpack.c.bf16 %v6207_v18, %v6202_v2  ;;  %v6317_v56 = vpack.c.bf16 %v6219_v17, %v6214_v5  ;;  %v6386_v2 = vpack.c.bf16 %v852_v45, %v845_v47  ;;  %v2657_v47 = vld [vmem:[#allocation2 + $0x108] sm:$0xff]  ;;  %v2658_v45 = vld [vmem:[#allocation2 + $0x110] sm:$0xff] }
 0x1c0   :  { %v6242_v62 = vand.u32 4294901760, %v706_v37  ;;  %v867_v43 = vsub.f32 %v6263_v24, %v866_v60  ;;  %v6394_v18 = vpack.c.bf16 %v866_v60, %v859_v54  ;;  %v1365_v58 = vrot.slane %v6221_v23, 2  ;;  %v2662_v60 = vld [vmem:[#allocation2 + $0x130] sm:$0xff] }
 0x1c2   :  { %v6245_v28 = vsub.f32 %v706_v37, %v6242_v62  ;;  %v833_v37 = vand.u32 4294901760, %v832_v8  ;;  %v860_v8 = vsub.f32 %v6258_v52, %v859_v54 }
 0x1c4   :  { %v806_v14 = vand.u32 4294901760, %v6245_v28  ;;  %v6279_v31 = vpack.c.bf16 %v840_v29, %v833_v37  ;;  %v868_v37 = vand.u32 4294901760, %v867_v43  ;;  %v6376_v43 = vpack.c.bf16 %v838_v30, %v831_v36 }
 0x1c6   :  { %v807_v25 = vsub.f32 %v6245_v28, %v806_v14 }
 0x1c8   :  { %v808_v32 = vand.u32 4294901760, %v807_v25  ;;  %v861_v25 = vand.u32 4294901760, %v860_v8  ;;  %v6366_v8 = vpack.c.bf16 %v824_v20, %v817_v16  ;;  %v6402_v16 = vpack.c.bf16 %v880_v50, %v873_v49 }
 0x1c9   :  { %v6410_v20 = vpack.c.bf16 %v894_v3, %v887_v19  ;;  %v6946_v49 = vand.u32 4294901760, %v6166_v9  ;;  %v2009_v9 = vrot.slane %v6221_v23, 4 }
 0x1ca   :  { %4091 = vmatmul.mubr.f32.vlgmr.msra.gmra.mrb[2].mxu1 %v808_v32  ;;  %v6292_v32 = vpack.c.bf16 %v854_v7, %v847_v11  ;;  %v6296_v29 = vpack.c.bf16 %v868_v37, %v861_v25  ;;  %v6325_v11 = vpack.c.bf16 %v6240_v48, %v6235_v42  ;;  %v6331_v7 = vpack.c.bf16 %v6263_v24, %v6258_v52  ;;  %v2659_v52 = vld [vmem:[#allocation2 + $0x118] sm:$0xff]  ;;  %v2660_v24 = vld [vmem:[#allocation2 + $0x120] sm:$0xff] }
 0x1cb   :  { %5068 = vmatpush3.bf16.msra.mxu1 %v6269_v21  ;;  %4125 = vmatprep.mubr.msk.f32.mxu1 %vm5733_vm0, %v5734_v59  ;;  %v6426_v50 = vpack.c.bf16 %v6946_v49, %v6945_v41  ;;  %v2664_v25 = vld [vmem:[#allocation2 + $0x140] sm:$0xff]  ;;  %v2665_v49 = vld [vmem:[#allocation2 + $0x148] sm:$0xff] }
 0x1cc   :  { %5069 = vmatprep.subr.bf16.mxu1 %v5731_v1 }
 0x1cf   :  { %5071 = vmatpush3.bf16.msra.mxu1 %v6279_v31 }
 0x1d0   :  { %5072 = vmatprep.subr.bf16.mxu1 %v5731_v1 }
 0x1d3   :  { %5074 = vmatpush3.bf16.msra.mxu1 %v6292_v32 }
 0x1d4   :  { %5075 = vmatprep.subr.bf16.mxu1 %v5731_v1 }
 0x1d7   :  { %5077 = vmatpush3.bf16.msra.mxu1 %v6296_v29 }
 0x1d8   :  { %5078 = vmatprep.subr.bf16.mxu1 %v5731_v1 }
 0x1db   :  { %5080 = vmatpush3.bf16.msra.mxu1 %v6145_v4 }
 0x1dc   :  { %5081 = vmatprep.subr.bf16.mxu1 %v5731_v1 }
 0x1df   :  { %5083 = vmatpush3.bf16.msra.mxu1 %v6159_v27 }
 0x1e0   :  { %5084 = vmatprep.subr.bf16.mxu1 %v5731_v1 }
 0x1e3   :  { %5086 = vmatpush3.bf16.msra.mxu1 %v6179_v0 }
 0x1e4   :  { %5087 = vmatprep.subr.bf16.mxu1 %v5731_v1 }
 0x1e7   :  { %5089 = vmatpush3.bf16.msra.mxu1 %v6181_v33 }
 0x1e8   :  { %5090 = vmatprep.subr.bf16.mxu1 %v5731_v1 }
 0x1ea   :  { %4126 = vmatmul.mubr.f32.vlgmr.msra.gmra.mrb[2].mxu1 %v6242_v62 }
 0x1eb   :  { %5092 = vmatpush3.bf16.msra.mxu1 %v6310_v53  ;;  %4160 = vmatprep.mubr.msk.f32.mxu1 %vm5733_vm0, %v5734_v59 }
 0x1ec   :  { %5093 = vmatprep.subr.bf16.mxu1 %v5731_v1 }
 0x1ef   :  { %5095 = vmatpush3.bf16.msra.mxu1 %v6317_v56 }
 0x1f0   :  { %5096 = vmatprep.subr.bf16.mxu1 %v5731_v1 }
 0x1f3   :  { %5098 = vmatpush3.bf16.msra.mxu1 %v6325_v11 }
 0x1f4   :  { %5099 = vmatprep.subr.bf16.mxu1 %v5731_v1 }
 0x1f7   :  { %5101 = vmatpush3.bf16.msra.mxu1 %v6331_v7 }
 0x1f8   :  { %5102 = vmatprep.subr.bf16.mxu1 %v5731_v1 }
 0x1fb   :  { %5104 = vmatpush3.bf16.msra.mxu1 %v6185_v34 }
 0x1fc   :  { %5105 = vmatprep.subr.bf16.mxu1 %v5731_v1 }
 0x1ff   :  { %5107 = vmatpush3.bf16.msra.mxu1 %v6189_v38 }
 0x200   :  { %5108 = vmatprep.subr.bf16.mxu1 %v5731_v1 }
 0x203   :  { %5110 = vmatpush3.bf16.msra.mxu1 %v6193_v51 }
 0x204   :  { %5111 = vmatprep.subr.bf16.mxu1 %v5731_v1 }
 0x207   :  { %5113 = vmatpush3.bf16.msra.mxu1 %v6197_v57 }
 0x208   :  { %5114 = vmatprep.subr.bf16.mxu1 %v5731_v1 }
 0x20a   :  { %4161 = vmatmul.mubr.f32.vlgmr.msra.gmra.mrb[2].mxu1 %v6245_v28 }
 0x20b   :  { %5116 = vmatpush3.bf16.msra.mxu1 %v6043_v35  ;;  %4195 = vmatprep.mubr.msk.f32.mxu1 %vm5733_vm0, %v5734_v59 }
 0x20c   :  { %5117 = vmatprep.subr.bf16.mxu1 %v5731_v1 }
 0x20f   :  { %5119 = vmatpush3.bf16.msra.mxu1 %v6065_v46 }
 0x210   :  { %5120 = vmatprep.subr.bf16.mxu1 %v5731_v1 }
 0x213   :  { %5122 = vmatpush3.bf16.msra.mxu1 %v6083_v55 }
 0x214   :  { %5123 = vmatprep.subr.bf16.mxu1 %v5731_v1 }
 0x217   :  { %5125 = vmatpush3.bf16.msra.mxu1 %v6095_v63 }
 0x218   :  { %5126 = vmatprep.subr.bf16.mxu1 %v5731_v1 }
 0x21b   :  { %5128 = vmatpush3.bf16.msra.mxu1 %v6103_v15 }
 0x21c   :  { %5129 = vmatprep.subr.bf16.mxu1 %v5731_v1 }
 0x21f   :  { %5131 = vmatpush3.bf16.msra.mxu1 %v6109_v44 }
 0x220   :  { %5132 = vmatprep.subr.bf16.mxu1 %v5731_v1 }
 0x223   :  { %5134 = vmatpush3.bf16.msra.mxu1 %v6115_v12 }
 0x224   :  { %5135 = vmatprep.subr.bf16.mxu1 %v5731_v1 }
 0x227   :  { %5137 = vmatpush3.bf16.msra.mxu1 %v6121_v39 }
 0x228   :  { %5138 = vmatprep.subr.bf16.mxu1 %v5731_v1 }
 0x22a   :  { %4196 = vmatmul.mubr.f32.vlgmr.msra.gmra.mrb[2].mxu1 %v806_v14  ;;  %v2661_v14 = vld [vmem:[#allocation2 + $0x128] sm:$0xff] }
 0x22b   :  { %5140 = vmatpush3.bf16.msra.mxu1 %v6366_v8  ;;  %4230 = vmatprep.mubr.msk.f32.mxu1 %vm5733_vm0, %v5734_v59  ;;  %v2693_v54 = vand.u32 4294901760, %v2661_v14 }
 0x22c   :  { %5141 = vmatprep.subr.bf16.mxu1 %v5731_v1 }
 0x22f   :  { %5143 = vmatpush3.bf16.msra.mxu1 %v6376_v43 }
 0x230   :  { %5144 = vmatprep.subr.bf16.mxu1 %v5731_v1 }
 0x233   :  { %5146 = vmatpush3.bf16.msra.mxu1 %v6386_v2 }
 0x234   :  { %5147 = vmatprep.subr.bf16.mxu1 %v5731_v1 }
 0x237   :  { %5149 = vmatpush3.bf16.msra.mxu1 %v6394_v18 }
 0x238   :  { %5150 = vmatprep.subr.bf16.mxu1 %v5731_v1 }
 0x23b   :  { %5152 = vmatpush3.bf16.msra.mxu1 %v6402_v16 }
 0x23c   :  { %5153 = vmatprep.subr.bf16.mxu1 %v5731_v1 }
 0x23f   :  { %5155 = vmatpush3.bf16.msra.mxu1 %v6410_v20 }
 0x240   :  { %5156 = vmatprep.subr.bf16.mxu1 %v5731_v1 }
 0x243   :  { %5158 = vmatpush3.bf16.msra.mxu1 %v6418_v40 }
 0x244   :  { %5159 = vmatprep.subr.bf16.mxu1 %v5731_v1 }
 0x247   :  { %5161 = vmatpush3.bf16.msra.mxu1 %v6426_v50 }
 0x248   :  { %5162 = vmatprep.subr.bf16.mxu1 %v5731_v1 }
 0x24a   :  { %4231 = vmatmul.mubr.f32.vlgmr.msra.gmra.mrb[2].mxu1 %v6242_v62 }
 0x24b   :  { %5164 = vmatpush3.bf16.msra.mxu1 %v6043_v35  ;;  %4265 = vmatprep.mubr.msk.f32.mxu1 %vm5733_vm0, %v5734_v59 }
 0x24c   :  { %5165 = vmatprep.subr.bf16.mxu1 %v5731_v1 }
 0x24f   :  { %5167 = vmatpush3.bf16.msra.mxu1 %v6065_v46 }
 0x250   :  { %5168 = vmatprep.subr.bf16.mxu1 %v5731_v1 }
 0x253   :  { %5170 = vmatpush3.bf16.msra.mxu1 %v6083_v55 }
 0x254   :  { %5171 = vmatprep.subr.bf16.mxu1 %v5731_v1 }
 0x257   :  { %5173 = vmatpush3.bf16.msra.mxu1 %v6095_v63 }
 0x258   :  { %5174 = vmatprep.subr.bf16.mxu1 %v5731_v1 }
 0x25b   :  { %5176 = vmatpush3.bf16.msra.mxu1 %v6103_v15 }
 0x25c   :  { %5177 = vmatprep.subr.bf16.mxu1 %v5731_v1 }
 0x25f   :  { %5179 = vmatpush3.bf16.msra.mxu1 %v6109_v44 }
 0x260   :  { %5180 = vmatprep.subr.bf16.mxu1 %v5731_v1 }
 0x263   :  { %5182 = vmatpush3.bf16.msra.mxu1 %v6115_v12 }
 0x264   :  { %5183 = vmatprep.subr.bf16.mxu1 %v5731_v1 }
 0x267   :  { %5185 = vmatpush3.bf16.msra.mxu1 %v6121_v39 }
 0x268   :  { %5330 = vmatprep.subr.bf16.mxu1 %v5731_v1 }
 0x26a   :  { %4266 = vmatmul.mubr.f32.vlgmr.msra.gmra.mrb[2].mxu1 %v6242_v62 }
 0x26b   :  { %5332 = vmatpush3.bf16.msra.mxu1 %v6043_v35  ;;  %4510 = vmatprep.mubr.msk.f32.mxu1 %vm5733_vm0, %v5734_v59 }
 0x26c   :  { %5333 = vmatprep.subr.bf16.mxu1 %v5731_v1 }
 0x26f   :  { %5335 = vmatpush3.bf16.msra.mxu1 %v6065_v46 }
 0x270   :  { %5336 = vmatprep.subr.bf16.mxu1 %v5731_v1 }
 0x273   :  { %5338 = vmatpush3.bf16.msra.mxu1 %v6083_v55 }
 0x274   :  { %5339 = vmatprep.subr.bf16.mxu1 %v5731_v1 }
 0x277   :  { %5341 = vmatpush3.bf16.msra.mxu1 %v6095_v63 }
 0x278   :  { %5342 = vmatprep.subr.bf16.mxu1 %v5731_v1 }
 0x27b   :  { %5344 = vmatpush3.bf16.msra.mxu1 %v6103_v15 }
 0x27c   :  { %5345 = vmatprep.subr.bf16.mxu1 %v5731_v1 }
 0x27f   :  { %5347 = vmatpush3.bf16.msra.mxu1 %v6109_v44 }
 0x280   :  { %5348 = vmatprep.subr.bf16.mxu1 %v5731_v1 }
 0x283   :  { %5350 = vmatpush3.bf16.msra.mxu1 %v6115_v12 }
 0x284   :  { %5351 = vmatprep.subr.bf16.mxu1 %v5731_v1 }
 0x287   :  { %5353 = vmatpush3.bf16.msra.mxu1 %v6121_v39 }
 0x288   :  { %5354 = vmatprep.subr.bf16.mxu1 %v5731_v1 }
 0x33d   :  { %v1360_v61 = vpop.f32.mrb[2].mxu1 }
 0x33e   :  { %v1367_v19 = vmul.f32 %v1365_v58, %v1360_v61  ;;  %v4267_v3 = vpop.f32.mrb[3].mxu1 }
 0x33f   :  { %v6617_v3 = vsub.f32 %v2661_v14, %v2693_v54 }
 0x340   :  { %v6470_v10 = vand.u32 4294901760, %v1367_v19 }
 0x342   :  { %v1450_v13 = vsub.f32 %v1367_v19, %v6470_v10 }
 0x344   :  { %v1451_v22 = vand.u32 4294901760, %v1450_v13 }
 0x346   :  { %v1452_v26 = vsub.f32 %v1450_v13, %v1451_v22 }
 0x348   :  { %v1453_v6 = vand.u32 4294901760, %v1452_v26  ;;  %v2705_v26 = vand.u32 4294901760, %v2665_v49 }
 0x34a   :  { %4301 = vmatmul.mubr.f32.vlgmr.msra.gmra.mrb[2].mxu0 %v1453_v6 }
 0x34b   :  { %5212 = vmatpush3.bf16.msra.mxu0 %v6269_v21  ;;  %4335 = vmatprep.mubr.msk.f32.mxu0 %vm5733_vm0, %v5734_v59 }
 0x34c   :  { %5213 = vmatprep.subr.bf16.mxu0 %v5731_v1 }
 0x34f   :  { %5215 = vmatpush3.bf16.msra.mxu0 %v6279_v31 }
 0x350   :  { %5216 = vmatprep.subr.bf16.mxu0 %v5731_v1 }
 0x353   :  { %5218 = vmatpush3.bf16.msra.mxu0 %v6292_v32 }
 0x354   :  { %5219 = vmatprep.subr.bf16.mxu0 %v5731_v1 }
 0x357   :  { %5221 = vmatpush3.bf16.msra.mxu0 %v6296_v29 }
 0x358   :  { %5222 = vmatprep.subr.bf16.mxu0 %v5731_v1 }
 0x35b   :  { %5224 = vmatpush3.bf16.msra.mxu0 %v6145_v4 }
 0x35c   :  { %5225 = vmatprep.subr.bf16.mxu0 %v5731_v1 }
 0x35f   :  { %5227 = vmatpush3.bf16.msra.mxu0 %v6159_v27 }
 0x360   :  { %5228 = vmatprep.subr.bf16.mxu0 %v5731_v1 }
 0x363   :  { %5230 = vmatpush3.bf16.msra.mxu0 %v6179_v0 }
 0x364   :  { %5231 = vmatprep.subr.bf16.mxu0 %v5731_v1 }
 0x367   :  { %5233 = vmatpush3.bf16.msra.mxu0 %v6181_v33 }
 0x368   :  { %5234 = vmatprep.subr.bf16.mxu0 %v5731_v1 }
 0x36a   :  { %4336 = vmatmul.mubr.f32.vlgmr.msra.gmra.mrb[2].mxu0 %v6470_v10 }
 0x36b   :  { %5236 = vmatpush3.bf16.msra.mxu0 %v6310_v53  ;;  %4370 = vmatprep.mubr.msk.f32.mxu0 %vm5733_vm0, %v5734_v59 }
 0x36c   :  { %5237 = vmatprep.subr.bf16.mxu0 %v5731_v1 }
 0x36f   :  { %5239 = vmatpush3.bf16.msra.mxu0 %v6317_v56 }
 0x370   :  { %5240 = vmatprep.subr.bf16.mxu0 %v5731_v1 }
 0x373   :  { %5242 = vmatpush3.bf16.msra.mxu0 %v6325_v11 }
 0x374   :  { %5243 = vmatprep.subr.bf16.mxu0 %v5731_v1 }
 0x377   :  { %5245 = vmatpush3.bf16.msra.mxu0 %v6331_v7 }
 0x378   :  { %5246 = vmatprep.subr.bf16.mxu0 %v5731_v1 }
 0x37b   :  { %5248 = vmatpush3.bf16.msra.mxu0 %v6185_v34 }
 0x37c   :  { %5249 = vmatprep.subr.bf16.mxu0 %v5731_v1 }
 0x37f   :  { %5251 = vmatpush3.bf16.msra.mxu0 %v6189_v38 }
 0x380   :  { %5252 = vmatprep.subr.bf16.mxu0 %v5731_v1 }
 0x383   :  { %5254 = vmatpush3.bf16.msra.mxu0 %v6193_v51 }
 0x384   :  { %5255 = vmatprep.subr.bf16.mxu0 %v5731_v1 }
 0x387   :  { %5257 = vmatpush3.bf16.msra.mxu0 %v6197_v57 }
 0x388   :  { %5258 = vmatprep.subr.bf16.mxu0 %v5731_v1 }
 0x38a   :  { %4371 = vmatmul.mubr.f32.vlgmr.msra.gmra.mrb[2].mxu0 %v1450_v13 }
 0x38b   :  { %5260 = vmatpush3.bf16.msra.mxu0 %v6043_v35  ;;  %4405 = vmatprep.mubr.msk.f32.mxu0 %vm5733_vm0, %v5734_v59 }
 0x38c   :  { %5261 = vmatprep.subr.bf16.mxu0 %v5731_v1 }
 0x38f   :  { %5263 = vmatpush3.bf16.msra.mxu0 %v6065_v46 }
 0x390   :  { %5264 = vmatprep.subr.bf16.mxu0 %v5731_v1 }
 0x393   :  { %5266 = vmatpush3.bf16.msra.mxu0 %v6083_v55 }
 0x394   :  { %5267 = vmatprep.subr.bf16.mxu0 %v5731_v1 }
 0x397   :  { %5269 = vmatpush3.bf16.msra.mxu0 %v6095_v63 }
 0x398   :  { %5270 = vmatprep.subr.bf16.mxu0 %v5731_v1 }
 0x39b   :  { %5272 = vmatpush3.bf16.msra.mxu0 %v6103_v15 }
 0x39c   :  { %5273 = vmatprep.subr.bf16.mxu0 %v5731_v1 }
 0x39f   :  { %5275 = vmatpush3.bf16.msra.mxu0 %v6109_v44 }
 0x3a0   :  { %5276 = vmatprep.subr.bf16.mxu0 %v5731_v1 }
 0x3a3   :  { %5278 = vmatpush3.bf16.msra.mxu0 %v6115_v12 }
 0x3a4   :  { %5279 = vmatprep.subr.bf16.mxu0 %v5731_v1 }
 0x3a7   :  { %5281 = vmatpush3.bf16.msra.mxu0 %v6121_v39 }
 0x3a8   :  { %5282 = vmatprep.subr.bf16.mxu0 %v5731_v1 }
 0x3aa   :  { %4406 = vmatmul.mubr.f32.vlgmr.msra.gmra.mrb[2].mxu0 %v1451_v22  ;;  %v2702_v22 = vand.u32 4294901760, %v2664_v25 }
 0x3ab   :  { %5284 = vmatpush3.bf16.msra.mxu0 %v6366_v8  ;;  %4440 = vmatprep.mubr.msk.f32.mxu0 %vm5733_vm0, %v5734_v59 }
 0x3ac   :  { %5285 = vmatprep.subr.bf16.mxu0 %v5731_v1 }
 0x3af   :  { %5287 = vmatpush3.bf16.msra.mxu0 %v6376_v43 }
 0x3b0   :  { %5288 = vmatprep.subr.bf16.mxu0 %v5731_v1 }
 0x3b3   :  { %5290 = vmatpush3.bf16.msra.mxu0 %v6386_v2 }
 0x3b4   :  { %5291 = vmatprep.subr.bf16.mxu0 %v5731_v1 }
 0x3b7   :  { %5293 = vmatpush3.bf16.msra.mxu0 %v6394_v18 }
 0x3b8   :  { %5294 = vmatprep.subr.bf16.mxu0 %v5731_v1 }
 0x3bb   :  { %5296 = vmatpush3.bf16.msra.mxu0 %v6402_v16 }
 0x3bc   :  { %5297 = vmatprep.subr.bf16.mxu0 %v5731_v1 }
 0x3bf   :  { %5299 = vmatpush3.bf16.msra.mxu0 %v6410_v20 }
 0x3c0   :  { %5300 = vmatprep.subr.bf16.mxu0 %v5731_v1 }
 0x3c3   :  { %5302 = vmatpush3.bf16.msra.mxu0 %v6418_v40 }
 0x3c4   :  { %5303 = vmatprep.subr.bf16.mxu0 %v5731_v1 }
 0x3c7   :  { %5305 = vmatpush3.bf16.msra.mxu0 %v6426_v50 }
 0x3c8   :  { %5306 = vmatprep.subr.bf16.mxu0 %v5731_v1 }
 0x3ca   :  { %4441 = vmatmul.mubr.f32.vlgmr.msra.gmra.mrb[2].mxu0 %v6470_v10 }
 0x3cb   :  { %5308 = vmatpush3.bf16.msra.mxu0 %v6043_v35  ;;  %4475 = vmatprep.mubr.msk.f32.mxu0 %vm5733_vm0, %v5734_v59 }
 0x3cc   :  { %5309 = vmatprep.subr.bf16.mxu0 %v5731_v1 }
 0x3cf   :  { %5311 = vmatpush3.bf16.msra.mxu0 %v6065_v46 }
 0x3d0   :  { %5312 = vmatprep.subr.bf16.mxu0 %v5731_v1 }
 0x3d3   :  { %5314 = vmatpush3.bf16.msra.mxu0 %v6083_v55 }
 0x3d4   :  { %5315 = vmatprep.subr.bf16.mxu0 %v5731_v1 }
 0x3d7   :  { %5317 = vmatpush3.bf16.msra.mxu0 %v6095_v63 }
 0x3d8   :  { %5318 = vmatprep.subr.bf16.mxu0 %v5731_v1 }
 0x3db   :  { %5320 = vmatpush3.bf16.msra.mxu0 %v6103_v15 }
 0x3dc   :  { %5321 = vmatprep.subr.bf16.mxu0 %v5731_v1 }
 0x3df   :  { %5323 = vmatpush3.bf16.msra.mxu0 %v6109_v44 }
 0x3e0   :  { %5324 = vmatprep.subr.bf16.mxu0 %v5731_v1 }
 0x3e3   :  { %5326 = vmatpush3.bf16.msra.mxu0 %v6115_v12 }
 0x3e4   :  { %5327 = vmatprep.subr.bf16.mxu0 %v5731_v1 }
 0x3e7   :  { %5329 = vmatpush3.bf16.msra.mxu0 %v6121_v39 }
 0x3e8   :  { %5474 = vmatprep.subr.bf16.mxu0 %v5731_v1 }
 0x3ea   :  { %4476 = vmatmul.mubr.f32.vlgmr.msra.gmra.mrb[2].mxu0 %v6470_v10  ;;  %v2696_v10 = vand.u32 4294901760, %v2662_v60 }
 0x3eb   :  { %4720 = vmatprep.mubr.msk.f32.mxu0 %vm5733_vm0, %v5734_v59 }
 0x3ec   :  { %v6621_v6 = vsub.f32 %v2662_v60, %v2696_v10 }
 0x4bd   :  { %v2005_v5 = vpop.f32.mrb[2].mxu0 }
 0x4be   :  { %v2011_v17 = vmul.f32 %v2009_v9, %v2005_v5  ;;  %v4477_v36 = vpop.f32.mrb[3].mxu0  ;;  %v6625_v5 = vsub.f32 %v2664_v25, %v2702_v22 }
 0x4c0   :  { %v6569_v30 = vand.u32 4294901760, %v2011_v17 }
 0x4c2   :  { %v6572_v42 = vsub.f32 %v2011_v17, %v6569_v30  ;;  %v6627_v17 = vsub.f32 %v2665_v49, %v2705_v26  ;;  %v2813_v49 = vand.u32 4294901760, %v6621_v6 }
 0x4c4   :  { %v2095_v48 = vand.u32 4294901760, %v6572_v42 }
 0x4c6   :  { %v2096_v62 = vsub.f32 %v6572_v42, %v2095_v48 }
 0x4c8   :  { %v2097_v28 = vand.u32 4294901760, %v2096_v62 }
 0x4ca   :  { %4511 = vmatmul.mubr.f32.vlgmr.msra.gmra.mrb[4].mxu1 %v2097_v28 }
 0x4cb   :  { %5356 = vmatpush3.bf16.msra.mxu1 %v6269_v21  ;;  %4545 = vmatprep.mubr.msk.f32.mxu1 %vm5733_vm0, %v5734_v59  ;;  %v2690_v21 = vand.u32 4294901760, %v2660_v24 }
 0x4cc   :  { %5357 = vmatprep.subr.bf16.mxu1 %v5731_v1 }
 0x4cd   :  { %v6613_v19 = vsub.f32 %v2660_v24, %v2690_v21  ;;  %v2806_v24 = vand.u32 4294901760, %v6617_v3 }
 0x4cf   :  { %5359 = vmatpush3.bf16.msra.mxu1 %v6279_v31  ;;  %v2656_v31 = vld [vmem:[#allocation2 + $0x100] sm:$0xff] }
 0x4d0   :  { %5360 = vmatprep.subr.bf16.mxu1 %v5731_v1 }
 0x4d3   :  { %5362 = vmatpush3.bf16.msra.mxu1 %v6292_v32  ;;  %v2663_v32 = vld [vmem:[#allocation2 + $0x138] sm:$0xff] }
 0x4d4   :  { %5363 = vmatprep.subr.bf16.mxu1 %v5731_v1  ;;  %v2699_v13 = vand.u32 4294901760, %v2663_v32 }
 0x4d6   :  { %v6623_v9 = vsub.f32 %v2663_v32, %v2699_v13  ;;  %v6637_v36 = vpack.c.bf16 %v2699_v13, %v2696_v10 }
 0x4d7   :  { %5365 = vmatpush3.bf16.msra.mxu1 %v6296_v29 }
 0x4d8   :  { %5366 = vmatprep.subr.bf16.mxu1 %v5731_v1  ;;  %v2820_v10 = vand.u32 4294901760, %v6623_v9 }
 0x4db   :  { %5368 = vmatpush3.bf16.msra.mxu1 %v6145_v4  ;;  %v2678_v4 = vand.u32 4294901760, %v2656_v31 }
 0x4dc   :  { %5369 = vmatprep.subr.bf16.mxu1 %v5731_v1 }
 0x4dd   :  { %v6603_v29 = vsub.f32 %v2656_v31, %v2678_v4 }
 0x4df   :  { %5371 = vmatpush3.bf16.msra.mxu1 %v6159_v27  ;;  %v2681_v27 = vand.u32 4294901760, %v2657_v47 }
 0x4e0   :  { %5372 = vmatprep.subr.bf16.mxu1 %v5731_v1 }
 0x4e1   :  { %v6601_v37 = vpack.c.bf16 %v2681_v27, %v2678_v4 }
 0x4e3   :  { %5374 = vmatpush3.bf16.msra.mxu1 %v6179_v0  ;;  %v2684_v0 = vand.u32 4294901760, %v2658_v45  ;;  %5476 = vmatpush3.bf16.msra.mxu0 %v6601_v37 }
 0x4e4   :  { %5375 = vmatprep.subr.bf16.mxu1 %v5731_v1  ;;  %5477 = vmatprep.subr.bf16.mxu0 %v5731_v1 }
 0x4e5   :  { %v6607_v41 = vsub.f32 %v2658_v45, %v2684_v0 }
 0x4e7   :  { %5377 = vmatpush3.bf16.msra.mxu1 %v6181_v33  ;;  %v2687_v33 = vand.u32 4294901760, %v2659_v52 }
 0x4e8   :  { %5378 = vmatprep.subr.bf16.mxu1 %v5731_v1 }
 0x4e9   :  { %v6609_v58 = vpack.c.bf16 %v2687_v33, %v2684_v0  ;;  %v6611_v61 = vsub.f32 %v2659_v52, %v2687_v33  ;;  %v2799_v0 = vand.u32 4294901760, %v6613_v19 }
 0x4ea   :  { %4546 = vmatmul.mubr.f32.vlgmr.msra.gmra.mrb[4].mxu1 %v6569_v30 }
 0x4eb   :  { %5380 = vmatpush3.bf16.msra.mxu1 %v6310_v53  ;;  %4580 = vmatprep.mubr.msk.f32.mxu1 %vm5733_vm0, %v5734_v59  ;;  %v6605_v53 = vsub.f32 %v2657_v47, %v2681_v27  ;;  %v2785_v47 = vand.u32 4294901760, %v6607_v41  ;;  %v2792_v45 = vand.u32 4294901760, %v6611_v61 }
 0x4ec   :  { %5381 = vmatprep.subr.bf16.mxu1 %v5731_v1  ;;  %5479 = vmatpush3.bf16.msra.mxu0 %v6609_v58 }
 0x4ed   :  { %5480 = vmatprep.subr.bf16.mxu0 %v5731_v1  ;;  %v2786_v27 = vsub.f32 %v6607_v41, %v2785_v47  ;;  %v2793_v52 = vsub.f32 %v6611_v61, %v2792_v45 }
 0x4ef   :  { %5383 = vmatpush3.bf16.msra.mxu1 %v6317_v56  ;;  %v6631_v56 = vpack.c.bf16 %v2693_v54, %v2690_v21  ;;  %v2787_v14 = vand.u32 4294901760, %v2786_v27  ;;  %v2794_v33 = vand.u32 4294901760, %v2793_v52  ;;  %v2800_v21 = vsub.f32 %v6613_v19, %v2799_v0 }
 0x4f0   :  { %5384 = vmatprep.subr.bf16.mxu1 %v5731_v1  ;;  %v2807_v54 = vsub.f32 %v6617_v3, %v2806_v24 }
 0x4f1   :  { %5482 = vmatpush3.bf16.msra.mxu0 %v6631_v56  ;;  %v5502_v60 = vpack.c.bf16 %v2794_v33, %v2787_v14  ;;  %v2801_v32 = vand.u32 4294901760, %v2800_v21 }
 0x4f2   :  { %5483 = vmatprep.subr.bf16.mxu0 %v5731_v1  ;;  %v2808_v25 = vand.u32 4294901760, %v2807_v54 }
 0x4f3   :  { %5386 = vmatpush3.bf16.msra.mxu1 %v6325_v11  ;;  %v6643_v11 = vpack.c.bf16 %v2705_v26, %v2702_v22  ;;  %v2814_v22 = vsub.f32 %v6621_v6, %v2813_v49  ;;  %v2821_v26 = vsub.f32 %v6623_v9, %v2820_v10 }
 0x4f4   :  { %5387 = vmatprep.subr.bf16.mxu1 %v5731_v1  ;;  %v5505_v13 = vpack.c.bf16 %v2808_v25, %v2801_v32 }
 0x4f5   :  { %5485 = vmatpush3.bf16.msra.mxu0 %v6637_v36 }
 0x4f6   :  { %5486 = vmatprep.subr.bf16.mxu0 %v5731_v1 }
 0x4f7   :  { %5389 = vmatpush3.bf16.msra.mxu1 %v6331_v7 }
 0x4f8   :  { %5390 = vmatprep.subr.bf16.mxu1 %v5731_v1 }
 0x4f9   :  { %5488 = vmatpush3.bf16.msra.mxu0 %v6643_v11 }
 0x4fa   :  { %5489 = vmatprep.subr.bf16.mxu0 %v5731_v1 }
 0x4fb   :  { %5392 = vmatpush3.bf16.msra.mxu1 %v6185_v34 }
 0x4fc   :  { %5393 = vmatprep.subr.bf16.mxu1 %v5731_v1 }
 0x4ff   :  { %5395 = vmatpush3.bf16.msra.mxu1 %v6189_v38  ;;  %v2669_v38 = vld [vmem:[#allocation2 + $0x168] sm:$0xff] }
 0x500   :  { %5396 = vmatprep.subr.bf16.mxu1 %v5731_v1 }
 0x503   :  { %5398 = vmatpush3.bf16.msra.mxu1 %v6193_v51  ;;  %v2717_v51 = vand.u32 4294901760, %v2669_v38 }
 0x504   :  { %5399 = vmatprep.subr.bf16.mxu1 %v5731_v1 }
 0x507   :  { %5401 = vmatpush3.bf16.msra.mxu1 %v6197_v57  ;;  %v2670_v57 = vld [vmem:[#allocation2 + $0x170] sm:$0xff] }
 0x508   :  { %5402 = vmatprep.subr.bf16.mxu1 %v5731_v1  ;;  %v2720_v7 = vand.u32 4294901760, %v2670_v57 }
 0x50a   :  { %4581 = vmatmul.mubr.f32.vlgmr.msra.gmra.mrb[4].mxu1 %v6572_v42  ;;  %v6737_v42 = vsub.f32 %v2669_v38, %v2717_v51 }
 0x50b   :  { %5404 = vmatpush3.bf16.msra.mxu1 %v6043_v35  ;;  %4615 = vmatprep.mubr.msk.f32.mxu1 %vm5733_vm0, %v5734_v59 }
 0x50c   :  { %5405 = vmatprep.subr.bf16.mxu1 %v5731_v1  ;;  %v6943_v52 = vand.u32 4294901760, %v6737_v42 }
 0x50e   :  { %v2863_v21 = vsub.f32 %v6737_v42, %v6943_v52 }
 0x50f   :  { %5407 = vmatpush3.bf16.msra.mxu1 %v6065_v46 }
 0x510   :  { %5408 = vmatprep.subr.bf16.mxu1 %v5731_v1  ;;  %v2864_v32 = vand.u32 4294901760, %v2863_v21 }
 0x513   :  { %5410 = vmatpush3.bf16.msra.mxu1 %v6083_v55 }
 0x514   :  { %5411 = vmatprep.subr.bf16.mxu1 %v5731_v1 }
 0x517   :  { %5413 = vmatpush3.bf16.msra.mxu1 %v6095_v63 }
 0x518   :  { %5414 = vmatprep.subr.bf16.mxu1 %v5731_v1 }
 0x51b   :  { %5416 = vmatpush3.bf16.msra.mxu1 %v6103_v15 }
 0x51c   :  { %5417 = vmatprep.subr.bf16.mxu1 %v5731_v1 }
 0x51f   :  { %5419 = vmatpush3.bf16.msra.mxu1 %v6109_v44 }
 0x520   :  { %5420 = vmatprep.subr.bf16.mxu1 %v5731_v1 }
 0x523   :  { %5422 = vmatpush3.bf16.msra.mxu1 %v6115_v12 }
 0x524   :  { %5423 = vmatprep.subr.bf16.mxu1 %v5731_v1 }
 0x527   :  { %5425 = vmatpush3.bf16.msra.mxu1 %v6121_v39 }
 0x528   :  { %5426 = vmatprep.subr.bf16.mxu1 %v5731_v1 }
 0x52a   :  { %4616 = vmatmul.mubr.f32.vlgmr.msra.gmra.mrb[4].mxu1 %v2095_v48  ;;  %v6740_v48 = vsub.f32 %v2670_v57, %v2720_v7 }
 0x52b   :  { %5428 = vmatpush3.bf16.msra.mxu1 %v6366_v8  ;;  %4650 = vmatprep.mubr.msk.f32.mxu1 %vm5733_vm0, %v5734_v59 }
 0x52c   :  { %5429 = vmatprep.subr.bf16.mxu1 %v5731_v1  ;;  %v6942_v25 = vand.u32 4294901760, %v6740_v48 }
 0x52f   :  { %5431 = vmatpush3.bf16.msra.mxu1 %v6376_v43  ;;  %v2771_v43 = vand.u32 4294901760, %v6603_v29 }
 0x530   :  { %5432 = vmatprep.subr.bf16.mxu1 %v5731_v1 }
 0x533   :  { %5434 = vmatpush3.bf16.msra.mxu1 %v6386_v2  ;;  %v2778_v2 = vand.u32 4294901760, %v6605_v53 }
 0x534   :  { %5435 = vmatprep.subr.bf16.mxu1 %v5731_v1 }
 0x537   :  { %5437 = vmatpush3.bf16.msra.mxu1 %v6394_v18 }
 0x538   :  { %5438 = vmatprep.subr.bf16.mxu1 %v5731_v1 }
 0x53b   :  { %5440 = vmatpush3.bf16.msra.mxu1 %v6402_v16  ;;  %v2772_v16 = vsub.f32 %v6603_v29, %v2771_v43 }
 0x53c   :  { %5441 = vmatprep.subr.bf16.mxu1 %v5731_v1 }
 0x53d   :  { %v2773_v28 = vand.u32 4294901760, %v2772_v16 }
 0x53f   :  { %5443 = vmatpush3.bf16.msra.mxu1 %v6410_v20  ;;  %v2779_v20 = vsub.f32 %v6605_v53, %v2778_v2 }
 0x540   :  { %5444 = vmatprep.subr.bf16.mxu1 %v5731_v1 }
 0x541   :  { %v2780_v31 = vand.u32 4294901760, %v2779_v20 }
 0x543   :  { %5446 = vmatpush3.bf16.msra.mxu1 %v6418_v40  ;;  %v6747_v4 = vpack.c.bf16 %v2780_v31, %v2773_v28 }
 0x544   :  { %5447 = vmatprep.subr.bf16.mxu1 %v5731_v1 }
 0x547   :  { %5449 = vmatpush3.bf16.msra.mxu1 %v6426_v50 }
 0x548   :  { %5450 = vmatprep.subr.bf16.mxu1 %v5731_v1 }
 0x54a   :  { %4651 = vmatmul.mubr.f32.vlgmr.msra.gmra.mrb[4].mxu1 %v6569_v30 }
 0x54b   :  { %5452 = vmatpush3.bf16.msra.mxu1 %v6043_v35  ;;  %4685 = vmatprep.mubr.msk.f32.mxu1 %vm5733_vm0, %v5734_v59  ;;  %v2666_v35 = vld [vmem:[#allocation2 + $0x150] sm:$0xff] }
 0x54c   :  { %5453 = vmatprep.subr.bf16.mxu1 %v5731_v1 }
 0x54f   :  { %5455 = vmatpush3.bf16.msra.mxu1 %v6065_v46  ;;  %v2667_v46 = vld [vmem:[#allocation2 + $0x158] sm:$0xff] }
 0x550   :  { %5456 = vmatprep.subr.bf16.mxu1 %v5731_v1 }
 0x553   :  { %5458 = vmatpush3.bf16.msra.mxu1 %v6083_v55  ;;  %v2708_v55 = vand.u32 4294901760, %v2666_v35 }
 0x554   :  { %5459 = vmatprep.subr.bf16.mxu1 %v5731_v1 }
 0x555   :  { %v6731_v40 = vsub.f32 %v2666_v35, %v2708_v55  ;;  %v2815_v35 = vand.u32 4294901760, %v2814_v22 }
 0x557   :  { %5461 = vmatpush3.bf16.msra.mxu1 %v6095_v63  ;;  %v2711_v63 = vand.u32 4294901760, %v2667_v46 }
 0x558   :  { %5462 = vmatprep.subr.bf16.mxu1 %v5731_v1 }
 0x559   :  { %v6713_v34 = vpack.c.bf16 %v2711_v63, %v2708_v55  ;;  %v6733_v50 = vsub.f32 %v2667_v46, %v2711_v63  ;;  %v2822_v46 = vand.u32 4294901760, %v2821_v26  ;;  %v2827_v55 = vand.u32 4294901760, %v6625_v5 }
 0x55a   :  { %v2834_v63 = vand.u32 4294901760, %v6627_v17 }
 0x55b   :  { %5464 = vmatpush3.bf16.msra.mxu1 %v6103_v15  ;;  %v2668_v15 = vld [vmem:[#allocation2 + $0x160] sm:$0xff]  ;;  %5491 = vmatpush3.bf16.msra.mxu0 %v6713_v34  ;;  %v2828_v38 = vsub.f32 %v6625_v5, %v2827_v55 }
 0x55c   :  { %5465 = vmatprep.subr.bf16.mxu1 %v5731_v1  ;;  %5492 = vmatprep.subr.bf16.mxu0 %v5731_v1 }
 0x55f   :  { %5467 = vmatpush3.bf16.msra.mxu1 %v6109_v44  ;;  %v2714_v44 = vand.u32 4294901760, %v2668_v15 }
 0x560   :  { %5468 = vmatprep.subr.bf16.mxu1 %v5731_v1 }
 0x563   :  { %5470 = vmatpush3.bf16.msra.mxu1 %v6115_v12  ;;  %v6717_v12 = vpack.c.bf16 %v2717_v51, %v2714_v44  ;;  %v2829_v51 = vand.u32 4294901760, %v2828_v38 }
 0x564   :  { %5471 = vmatprep.subr.bf16.mxu1 %v5731_v1 }
 0x565   :  { %5494 = vmatpush3.bf16.msra.mxu0 %v6717_v12 }
 0x566   :  { %5495 = vmatprep.subr.bf16.mxu0 %v5731_v1 }
 0x567   :  { %5473 = vmatpush3.bf16.msra.mxu1 %v6121_v39  ;;  %v2671_v39 = vld [vmem:[#allocation2 + $0x178] sm:$0xff] }
 0x568   :  { %v2723_v8 = vand.u32 4294901760, %v2671_v39 }
 0x56a   :  { %4686 = vmatmul.mubr.f32.vlgmr.msra.gmra.mrb[4].mxu1 %v6569_v30  ;;  %v6723_v18 = vpack.c.bf16 %v2723_v8, %v2720_v7  ;;  %v6735_v30 = vsub.f32 %v2668_v15, %v2714_v44  ;;  %v6742_v62 = vsub.f32 %v2671_v39, %v2723_v8  ;;  %v5508_v15 = vpack.c.bf16 %v2822_v46, %v2815_v35 }
 0x56b   :  { %v2835_v44 = vsub.f32 %v6627_v17, %v2834_v63  ;;  %v2841_v39 = vand.u32 4294901760, %v6731_v40  ;;  %v2848_v7 = vand.u32 4294901760, %v6733_v50  ;;  %v2870_v35 = vsub.f32 %v6740_v48, %v6942_v25 }
 0x56c   :  { %5497 = vmatpush3.bf16.msra.mxu0 %v6723_v18  ;;  %v6944_v27 = vand.u32 4294901760, %v6735_v30  ;;  %v6941_v22 = vand.u32 4294901760, %v6742_v62  ;;  %v5541_v21 = vpack.c.bf16 %v6737_v42, %v6735_v30 }
 0x56d   :  { %5498 = vmatprep.subr.bf16.mxu0 %v5731_v1  ;;  %v2836_v57 = vand.u32 4294901760, %v2835_v44  ;;  %v2842_v16 = vsub.f32 %v6731_v40, %v2841_v39  ;;  %v2849_v20 = vsub.f32 %v6733_v50, %v2848_v7  ;;  %v2871_v38 = vand.u32 4294901760, %v2870_v35 }
 0x56e   :  { %v2856_v33 = vsub.f32 %v6735_v30, %v6944_v27  ;;  %v2877_v46 = vsub.f32 %v6742_v62, %v6941_v22 }
 0x56f   :  { %v5511_v8 = vpack.c.bf16 %v2836_v57, %v2829_v51  ;;  %v2843_v28 = vand.u32 4294901760, %v2842_v16  ;;  %v2850_v31 = vand.u32 4294901760, %v2849_v20  ;;  %v5523_v57 = vpack.c.bf16 %v6605_v53, %v6603_v29 }
 0x570   :  { %v2857_v54 = vand.u32 4294901760, %v2856_v33  ;;  %v2878_v44 = vand.u32 4294901760, %v2877_v46  ;;  %v5526_v16 = vpack.c.bf16 %v6611_v61, %v6607_v41  ;;  %v5529_v20 = vpack.c.bf16 %v6617_v3, %v6613_v19 }
 0x571   :  { %v5514_v14 = vpack.c.bf16 %v2850_v31, %v2843_v28  ;;  %v5532_v28 = vpack.c.bf16 %v6623_v9, %v6621_v6  ;;  %v5535_v31 = vpack.c.bf16 %v6627_v17, %v6625_v5  ;;  %v5538_v33 = vpack.c.bf16 %v6733_v50, %v6731_v40 }
 0x572   :  { %v5517_v26 = vpack.c.bf16 %v2864_v32, %v2857_v54  ;;  %v5520_v51 = vpack.c.bf16 %v2878_v44, %v2871_v38  ;;  %v5544_v54 = vpack.c.bf16 %v6742_v62, %v6740_v48  ;;  %v2653_v32 = vrot.slane %v6221_v23, 6 }
 0x573   :  { %v5571_v23 = vpack.c.bf16 %v2778_v2, %v2771_v43  ;;  %v5577_v29 = vpack.c.bf16 %v2806_v24, %v2799_v0  ;;  %v5580_v53 = vpack.c.bf16 %v2820_v10, %v2813_v49  ;;  %v5583_v41 = vpack.c.bf16 %v2834_v63, %v2827_v55 }
 0x574   :  { %v5586_v61 = vpack.c.bf16 %v2848_v7, %v2841_v39  ;;  %v6947_v19 = vand.u32 4294901760, %v6735_v30  ;;  %v6948_v3 = vand.u32 4294901760, %v6737_v42  ;;  %v6949_v9 = vand.u32 4294901760, %v6740_v48 }
 0x575   :  { %v6950_v5 = vand.u32 4294901760, %v6742_v62 }
 0x576   :  { %v5589_v6 = vpack.c.bf16 %v6948_v3, %v6947_v19 }
 0x577   :  { %v5592_v17 = vpack.c.bf16 %v6950_v5, %v6949_v9 }
 0x63d   :  { %v2649_v35 = vpop.f32.mrb[4].mxu1 }
 0x63e   :  { %v2655_v46 = vmul.f32 %v2653_v32, %v2649_v35  ;;  %v4687_v38 = vpop.f32.mrb[5].mxu1 }
 0x640   :  { %v6820_v44 = vand.u32 4294901760, %v2655_v46 }
 0x642   :  { %v2759_v22 = vsub.f32 %v2655_v46, %v6820_v44 }
 0x644   :  { %v2760_v25 = vand.u32 4294901760, %v2759_v22 }
 0x646   :  { %v2761_v52 = vsub.f32 %v2759_v22, %v2760_v25 }
 0x648   :  { %v2762_v27 = vand.u32 4294901760, %v2761_v52 }
 0x64a   :  { %4721 = vmatmul.mubr.f32.vlgmr.msra.gmra.mrb[4].mxu0 %v2762_v27 }
 0x64b   :  { %5500 = vmatpush3.bf16.msra.mxu0 %v6747_v4  ;;  %4755 = vmatprep.mubr.msk.f32.mxu0 %vm5733_vm0, %v5734_v59  ;;  %v5574_v4 = vpack.c.bf16 %v2792_v45, %v2785_v47 }
 0x64c   :  { %5501 = vmatprep.subr.bf16.mxu0 %v5731_v1 }
 0x64f   :  { %5503 = vmatpush3.bf16.msra.mxu0 %v5502_v60 }
 0x650   :  { %5504 = vmatprep.subr.bf16.mxu0 %v5731_v1 }
 0x653   :  { %5506 = vmatpush3.bf16.msra.mxu0 %v5505_v13 }
 0x654   :  { %5507 = vmatprep.subr.bf16.mxu0 %v5731_v1 }
 0x657   :  { %5509 = vmatpush3.bf16.msra.mxu0 %v5508_v15 }
 0x658   :  { %5510 = vmatprep.subr.bf16.mxu0 %v5731_v1 }
 0x65b   :  { %5512 = vmatpush3.bf16.msra.mxu0 %v5511_v8 }
 0x65c   :  { %5513 = vmatprep.subr.bf16.mxu0 %v5731_v1 }
 0x65f   :  { %5515 = vmatpush3.bf16.msra.mxu0 %v5514_v14 }
 0x660   :  { %5516 = vmatprep.subr.bf16.mxu0 %v5731_v1 }
 0x663   :  { %5518 = vmatpush3.bf16.msra.mxu0 %v5517_v26 }
 0x664   :  { %5519 = vmatprep.subr.bf16.mxu0 %v5731_v1 }
 0x667   :  { %5521 = vmatpush3.bf16.msra.mxu0 %v5520_v51 }
 0x668   :  { %5522 = vmatprep.subr.bf16.mxu0 %v5731_v1 }
 0x66a   :  { %4756 = vmatmul.mubr.f32.vlgmr.msra.gmra.mrb[4].mxu0 %v6820_v44 }
 0x66b   :  { %5524 = vmatpush3.bf16.msra.mxu0 %v5523_v57  ;;  %4790 = vmatprep.mubr.msk.f32.mxu0 %vm5733_vm0, %v5734_v59 }
 0x66c   :  { %5525 = vmatprep.subr.bf16.mxu0 %v5731_v1 }
 0x66f   :  { %5527 = vmatpush3.bf16.msra.mxu0 %v5526_v16 }
 0x670   :  { %5528 = vmatprep.subr.bf16.mxu0 %v5731_v1 }
 0x673   :  { %5530 = vmatpush3.bf16.msra.mxu0 %v5529_v20 }
 0x674   :  { %5531 = vmatprep.subr.bf16.mxu0 %v5731_v1 }
 0x677   :  { %5533 = vmatpush3.bf16.msra.mxu0 %v5532_v28 }
 0x678   :  { %5534 = vmatprep.subr.bf16.mxu0 %v5731_v1 }
 0x67b   :  { %5536 = vmatpush3.bf16.msra.mxu0 %v5535_v31 }
 0x67c   :  { %5537 = vmatprep.subr.bf16.mxu0 %v5731_v1 }
 0x67f   :  { %5539 = vmatpush3.bf16.msra.mxu0 %v5538_v33 }
 0x680   :  { %5540 = vmatprep.subr.bf16.mxu0 %v5731_v1 }
 0x683   :  { %5542 = vmatpush3.bf16.msra.mxu0 %v5541_v21 }
 0x684   :  { %5543 = vmatprep.subr.bf16.mxu0 %v5731_v1 }
 0x687   :  { %5545 = vmatpush3.bf16.msra.mxu0 %v5544_v54 }
 0x688   :  { %5546 = vmatprep.subr.bf16.mxu0 %v5731_v1 }
 0x68a   :  { %4791 = vmatmul.mubr.f32.vlgmr.msra.gmra.mrb[4].mxu0 %v2759_v22 }
 0x68b   :  { %5548 = vmatpush3.bf16.msra.mxu0 %v6601_v37  ;;  %4825 = vmatprep.mubr.msk.f32.mxu0 %vm5733_vm0, %v5734_v59 }
 0x68c   :  { %5549 = vmatprep.subr.bf16.mxu0 %v5731_v1 }
 0x68f   :  { %5551 = vmatpush3.bf16.msra.mxu0 %v6609_v58 }
 0x690   :  { %5552 = vmatprep.subr.bf16.mxu0 %v5731_v1 }
 0x693   :  { %5554 = vmatpush3.bf16.msra.mxu0 %v6631_v56 }
 0x694   :  { %5555 = vmatprep.subr.bf16.mxu0 %v5731_v1 }
 0x697   :  { %5557 = vmatpush3.bf16.msra.mxu0 %v6637_v36 }
 0x698   :  { %5558 = vmatprep.subr.bf16.mxu0 %v5731_v1 }
 0x69b   :  { %5560 = vmatpush3.bf16.msra.mxu0 %v6643_v11 }
 0x69c   :  { %5561 = vmatprep.subr.bf16.mxu0 %v5731_v1 }
 0x69f   :  { %5563 = vmatpush3.bf16.msra.mxu0 %v6713_v34 }
 0x6a0   :  { %5564 = vmatprep.subr.bf16.mxu0 %v5731_v1 }
 0x6a3   :  { %5566 = vmatpush3.bf16.msra.mxu0 %v6717_v12 }
 0x6a4   :  { %5567 = vmatprep.subr.bf16.mxu0 %v5731_v1 }
 0x6a7   :  { %5569 = vmatpush3.bf16.msra.mxu0 %v6723_v18 }
 0x6a8   :  { %5570 = vmatprep.subr.bf16.mxu0 %v5731_v1 }
 0x6aa   :  { %4826 = vmatmul.mubr.f32.vlgmr.msra.gmra.mrb[4].mxu0 %v2760_v25 }
 0x6ab   :  { %5572 = vmatpush3.bf16.msra.mxu0 %v5571_v23  ;;  %4860 = vmatprep.mubr.msk.f32.mxu0 %vm5733_vm0, %v5734_v59 }
 0x6ac   :  { %5573 = vmatprep.subr.bf16.mxu0 %v5731_v1 }
 0x6af   :  { %5575 = vmatpush3.bf16.msra.mxu0 %v5574_v4 }
 0x6b0   :  { %5576 = vmatprep.subr.bf16.mxu0 %v5731_v1 }
 0x6b3   :  { %5578 = vmatpush3.bf16.msra.mxu0 %v5577_v29 }
 0x6b4   :  { %5579 = vmatprep.subr.bf16.mxu0 %v5731_v1 }
 0x6b7   :  { %5581 = vmatpush3.bf16.msra.mxu0 %v5580_v53 }
 0x6b8   :  { %5582 = vmatprep.subr.bf16.mxu0 %v5731_v1 }
 0x6bb   :  { %5584 = vmatpush3.bf16.msra.mxu0 %v5583_v41 }
 0x6bc   :  { %5585 = vmatprep.subr.bf16.mxu0 %v5731_v1 }
 0x6bf   :  { %5587 = vmatpush3.bf16.msra.mxu0 %v5586_v61 }
 0x6c0   :  { %5588 = vmatprep.subr.bf16.mxu0 %v5731_v1 }
 0x6c3   :  { %5590 = vmatpush3.bf16.msra.mxu0 %v5589_v6 }
 0x6c4   :  { %5591 = vmatprep.subr.bf16.mxu0 %v5731_v1 }
 0x6c7   :  { %5593 = vmatpush3.bf16.msra.mxu0 %v5592_v17 }
 0x6c8   :  { %5594 = vmatprep.subr.bf16.mxu0 %v5731_v1 }
 0x6ca   :  { %4861 = vmatmul.mubr.f32.vlgmr.msra.gmra.mrb[4].mxu0 %v6820_v44 }
 0x6cb   :  { %5596 = vmatpush3.bf16.msra.mxu0 %v6601_v37  ;;  %4895 = vmatprep.mubr.msk.f32.mxu0 %vm5733_vm0, %v5734_v59  ;;  %v3337_v59 = vld [vmem:[#allocation2 + $0x181] ss:$0 sm:$0xff] }
 0x6cc   :  { %5597 = vmatprep.subr.bf16.mxu0 %v5731_v1 }
 0x6cf   :  { %5599 = vmatpush3.bf16.msra.mxu0 %v6609_v58 }
 0x6d0   :  { %5600 = vmatprep.subr.bf16.mxu0 %v5731_v1 }
 0x6d3   :  { %5602 = vmatpush3.bf16.msra.mxu0 %v6631_v56 }
 0x6d4   :  { %5603 = vmatprep.subr.bf16.mxu0 %v5731_v1 }
 0x6d7   :  { %5605 = vmatpush3.bf16.msra.mxu0 %v6637_v36 }
 0x6d8   :  { %5606 = vmatprep.subr.bf16.mxu0 %v5731_v1 }
 0x6db   :  { %5608 = vmatpush3.bf16.msra.mxu0 %v6643_v11 }
 0x6dc   :  { %5609 = vmatprep.subr.bf16.mxu0 %v5731_v1 }
 0x6df   :  { %5611 = vmatpush3.bf16.msra.mxu0 %v6713_v34 }
 0x6e0   :  { %5612 = vmatprep.subr.bf16.mxu0 %v5731_v1 }
 0x6e3   :  { %5614 = vmatpush3.bf16.msra.mxu0 %v6717_v12 }
 0x6e4   :  { %5615 = vmatprep.subr.bf16.mxu0 %v5731_v1 }
 0x6e7   :  { %5617 = vmatpush3.bf16.msra.mxu0 %v6723_v18 }
 0x6ea   :  { %4896 = vmatmul.mubr.f32.vlgmr.msra.gmra.mrb[4].mxu0 %v6820_v44 }
 0x7bd   :  { %v3314_v37 = vpop.f32.mrb[4].mxu0 }
 0x7be   :  { %v5619_v58 = vadd.f32 %v3337_v59, %v3314_v37  ;;  %v4897_v56 = vpop.f32.mrb[5].mxu0 }
 0x7c0   :  { %3318 = vst [vmem:[#allocation5] sm:$0x3] %v5619_v58 }
 0x7c1   :  { %5712 = shalt.err (!%p5709_p12)
}
 0x7c2   :  { %s5713_s28 = scalar_lea.hbm %s6938_s2, 32 }
 0x7c3   :  { %p5714_p13 = scmp.ne.s32.totalorder %s6938_s2, %s5713_s28  ;;  %p5717_p0 = scmp.lt.u32.totalorder %s5713_s28, %s6938_s2 }
 0x7c5   :  { %p5719_p1 = pnand %p5717_p0, %p5714_p13 }
 0x7c7   :  { %5722 = shalt.err (!%p5719_p1)
}
 0x7c8   :  { %3328 = dma.vmem_to_hbm [thread:$0]  %s3326_s1, 32, %s6938_s2, [#allocation4]  }
 0x7c9   :  { %5725 = dma.done.wait [#allocation4], 32  }
 0x7ca   :  { %5726 = vsyncadd [#allocation4], 4294967264 }
 0x7cb   :  { %3332 = vsyncpa [#allocation3], 1 }
 0x7cc   :  { %3333 = vsyncpa [#allocation4], 1 }

</bundles_post_ra>
